<compile_context>
chip_gen: v7x
topology: tpu7x:2x2x1
jax: 0.10.0
libtpu: 0.0.40
codegen_flags: <defaults>
</compile_context>

<pallas_src>
import math

import jax
import jax.numpy as jnp
import numpy as np
from jax.experimental import pallas as pl

# ----------------------------- problem sizes --------------------------------
B, R, S, D = 2, 4, 8, 32          # batch, residues, sequence, dim
NUM_HEADS, HID = 4, 8             # num_heads, hidden_dim
HHD = NUM_HEADS * HID             # 32
INF, EPS = 1e9, 1e-10
BR = B * R                        # flattened (batch, residue) rows   (8)
N = BR * S                        # total tokens                      (64)
_HI = jax.lax.Precision.HIGHEST

# -------- input-independent helper matrices (hoisted, module level) ----------
_EYE_BR = np.eye(BR, dtype=np.float32)
# REP_BH[b*H+h, b'] = 1 iff b' == b          (repeat each q row once per head)
REP_BH = np.repeat(_EYE_BR, NUM_HEADS, axis=0)                           # [BR*H, BR]
# BCAST_BH[n, b*H+h] = 1 iff b == n//S       (token -> its (b,r) row, any head)
BCAST_BH = np.repeat(np.repeat(_EYE_BR, S, axis=0), NUM_HEADS, axis=1)   # [N, BR*H]
# HEAD_MASK[b*H+h, h'*hd+j] = 1 iff h == h'
HEAD_MASK = np.tile(np.repeat(np.eye(NUM_HEADS, dtype=np.float32), HID, axis=1),
                    (BR, 1))                                             # [BR*H, H*hd]
# TILE_EYE[j, h*hd+j'] = 1 iff j == j'       (copies a width-hd block per head)
TILE_EYE = np.tile(np.eye(HID, dtype=np.float32), (1, NUM_HEADS))        # [hd, H*hd]


# ------------------------------ Pallas kernel --------------------------------
def global_attention_kernel(m_ref, sel_ref, inv_den_ref, bias_ref, rep_ref,
                            hmask_ref, tile_eye_ref, bcast_ref, wq_ref,
                            wkvg_ref, bg_ref, wo_ref, bo_ref, out_ref):
    m = m_ref[...]                                                     # [N, D]

    # masked-mean query per (b, r) row; 1/(sum(mask)+eps) precomputed (exact).
    q_mean = jnp.dot(sel_ref[...], m, precision=_HI,
                     preferred_element_type=jnp.float32) * inv_den_ref[...]  # [BR, D]

    # q projection; hidden_dim**-0.5 already folded into wq wrapper-side.
    q = jnp.dot(q_mean, wq_ref[...], precision=_HI,
                preferred_element_type=jnp.float32)                    # [BR, H*hd]

    # fused k/v/g projection: ONE matmul over all tokens, then lane slices.
    kvg = jnp.dot(m, wkvg_ref[...], precision=_HI,
                  preferred_element_type=jnp.float32)                  # [N, 2*H*hd+hd]
    k_t = kvg[:, :HHD]                            # [N, H*hd]  (k tiled per head)
    g = jax.nn.sigmoid(kvg[:, HHD:2 * HHD] + bg_ref[...])              # [N, H*hd]
    v = kvg[:, 2 * HHD:2 * HHD + HID]                                  # [N, hd]

    # ---- all heads batched: rows of q_bh are (batch-row, head) pairs --------
    # q_bh[b*H+h, h'*hd+j] = q[b, h*hd+j] if h == h' else 0
    q_bh = jnp.dot(rep_ref[...], q, precision=_HI,
                   preferred_element_type=jnp.float32) * hmask_ref[...]  # [BR*H, H*hd]
    # logits[b*H+h, n] = <q[b, head h], k[n]>  (k_t repeats k in every head block)
    logits = jax.lax.dot_general(q_bh, k_t, (((1,), (1,)), ((), ())),
                                 precision=_HI,
                                 preferred_element_type=jnp.float32)
    logits = logits + bias_ref[...]                                    # [BR*H, N]
    logits = logits - jnp.max(logits, axis=-1, keepdims=True)
    p = jnp.exp(logits)
    p = p / jnp.sum(p, axis=-1, keepdims=True)          # exact softmax normalisation
    o_bh = jnp.dot(p, v, precision=_HI,
                   preferred_element_type=jnp.float32)                 # [BR*H, hd]

    # place each head's output in its column block, then broadcast rows -> tokens
    o_wide = jnp.dot(o_bh, tile_eye_ref[...], precision=_HI,
                     preferred_element_type=jnp.float32) * hmask_ref[...]  # [BR*H, H*hd]
    o_tok = jnp.dot(bcast_ref[...], o_wide, precision=_HI,
                    preferred_element_type=jnp.float32)                # [N, H*hd]

    # gate + output projection (output bias folded into the same add)
    out_ref[...] = jnp.dot(g * o_tok, wo_ref[...], precision=_HI,
                           preferred_element_type=jnp.float32) + bo_ref[...]  # [N, D]


# ------------------------------- wrapper --------------------------------------
def _full_spec(shape):
    return pl.BlockSpec(shape, lambda: (0,) * len(shape))


@jax.jit
def global_attention(m, mask, params):
    """m: [B, R, S, D] float32, mask: [B, R, S] float32 -> [B, R, S, D]."""
    wq, wk, wv, wg, bg, wo, bo = params

    m_flat = m.reshape(N, D)                               # [N, D]
    mask2 = mask.reshape(BR, S)                            # [BR, S]
    eye = jnp.eye(BR, dtype=m.dtype)
    # sel[b, b'*S + s] = mask[b', s] if b' == b else 0     (block-diagonal mask)
    sel = (eye[:, :, None] * mask2[None, :, :]).reshape(BR, N)
    inv_den = 1.0 / (jnp.sum(mask2, axis=-1, keepdims=True) + EPS)         # [BR, 1]
    bias_h = jnp.repeat(INF * (sel - 1.0), NUM_HEADS, axis=0)              # [BR*H, N]

    wq_s = wq * (HID ** -0.5)                              # fold softmax scale into wq
    # fused [k (tiled per head) | g | v] projection weight: [D, 2*H*hd + hd]
    w_kvg = jnp.concatenate([jnp.tile(wk, (1, NUM_HEADS)), wg, wv], axis=1)

    operands = (m_flat, sel, inv_den, bias_h,
                jnp.asarray(REP_BH), jnp.asarray(HEAD_MASK),
                jnp.asarray(TILE_EYE), jnp.asarray(BCAST_BH),
                wq_s, w_kvg, bg, wo, bo)

    out = pl.pallas_call(
        global_attention_kernel,
        out_shape=jax.ShapeDtypeStruct((N, D), jnp.float32),
        in_specs=[_full_spec(op.shape) for op in operands],
        out_specs=_full_spec((N, D)),
    )(*operands)
    return out.reshape(B, R, S, D)


# ------------------------------ JAX reference --------------------------------
def global_attention_ref(m, mask, params):
    wq, wk, wv, wg, bg, wo, bo = params
    with jax.default_matmul_precision("highest"):
        q = jnp.sum(m * mask[..., None], axis=-2) / (jnp.sum(mask, axis=-1)[..., None] + EPS)
        q = (q @ wq) * (HID ** -0.5)
        q = q.reshape(q.shape[:-1] + (NUM_HEADS, HID))                 # [B,R,H,hd]
        k = m @ wk                                                     # [B,R,S,hd]
        v = m @ wv
        bias = (INF * (mask - 1.0))[..., :, None, :]                   # [B,R,1,S]
        a = jnp.einsum('brhk,brsk->brhs', q, k) + bias
        a = jax.nn.softmax(a, axis=-1)
        o = jnp.einsum('brhs,brsk->brhk', a, v)                        # [B,R,H,hd]
        g = jax.nn.sigmoid(m @ wg + bg)                                # [B,R,S,H*hd]
        g = g.reshape(g.shape[:-1] + (NUM_HEADS, HID))
        o = o[..., None, :, :] * g                                     # [B,R,S,H,hd]
        o = o.reshape(o.shape[:-2] + (-1,))
        return o @ wo + bo


# ------------------------------ parameter init --------------------------------
def glorot(key, shape):
    lim = math.sqrt(6.0 / (shape[0] + shape[1]))
    return jax.random.uniform(key, shape, jnp.float32, -lim, lim)


def make_params(key):
    # NOTE: original module uses zero-init for 'gating'/'final' layers; we use
    # deterministic random values so the kernel computation is non-trivial.
    ks = jax.random.split(key, 7)
    wq = glorot(ks[0], (D, NUM_HEADS * HID))
    wk = glorot(ks[1], (D, HID))
    wv = glorot(ks[2], (D, HID))
    wg = glorot(ks[3], (D, NUM_HEADS * HID))
    bg = 0.1 * jax.random.normal(ks[4], (1, NUM_HEADS * HID), jnp.float32)
    wo = glorot(ks[5], (NUM_HEADS * HID, D))
    bo = 0.1 * jax.random.normal(ks[6], (1, D), jnp.float32)
    return wq, wk, wv, wg, bg, wo, bo


# ---------------------------------- main --------------------------------------
if __name__ == "__main__":
    key = jax.random.PRNGKey(0)
    k_m, k_mask, k_p = jax.random.split(key, 3)

    m = jax.random.normal(k_m, (B, R, S, D), jnp.float32)
    mask = (jax.random.uniform(k_mask, (B, R, S)) > 0.3).astype(jnp.float32)
    mask = mask.at[..., 0].set(1.0)   # guarantee >=1 valid position per row

    params = make_params(k_p)

    out = jax.block_until_ready(global_attention(m, mask, params))
    ref = jax.block_until_ready(global_attention_ref(m, mask, params))

    np.testing.assert_allclose(np.asarray(out), np.asarray(ref),
                               rtol=2e-2, atol=2e-3)
    print("KERNEL_OK")
</pallas_src>

<mosaic_0001>
module attributes {stable_mosaic.version = 11 : i64} {
  func.func @global_attention_kernel(%arg0: memref<64x32xf32, #tpu.memory_space<vmem>>, %arg1: memref<8x64xf32, #tpu.memory_space<vmem>>, %arg2: memref<8x1xf32, #tpu.memory_space<vmem>>, %arg3: memref<32x64xf32, #tpu.memory_space<vmem>>, %arg4: memref<32x8xf32, #tpu.memory_space<vmem>>, %arg5: memref<32x32xf32, #tpu.memory_space<vmem>>, %arg6: memref<8x32xf32, #tpu.memory_space<vmem>>, %arg7: memref<64x32xf32, #tpu.memory_space<vmem>>, %arg8: memref<32x32xf32, #tpu.memory_space<vmem>>, %arg9: memref<32x72xf32, #tpu.memory_space<vmem>>, %arg10: memref<1x32xf32, #tpu.memory_space<vmem>>, %arg11: memref<32x32xf32, #tpu.memory_space<vmem>>, %arg12: memref<1x32xf32, #tpu.memory_space<vmem>>, %arg13: memref<64x32xf32, #tpu.memory_space<vmem>>) attributes {dimension_semantics = [], scalar_prefetch = 0 : i64, scratch_operands = 0 : i64, tpu.core_type = #tpu.core_type<tc>} {
    %c0 = arith.constant 0 : index
    %c0_0 = arith.constant 0 : index
    %0 = vector.load %arg0[%c0, %c0_0] : memref<64x32xf32, #tpu.memory_space<vmem>>, vector<64x32xf32>
    %c0_1 = arith.constant 0 : index
    %c0_2 = arith.constant 0 : index
    %1 = vector.load %arg1[%c0_1, %c0_2] : memref<8x64xf32, #tpu.memory_space<vmem>>, vector<8x64xf32>
    %cst = arith.constant dense<0.000000e+00> : vector<8x32xf32>
    %2 = tpu.matmul %1, %0, %cst {dimension_numbers = #tpu.dot_dimension_numbers<[1], [0], [0], [1], [0, 0, 1, 1], [], []>, precision = #tpu.contract_precision<fp32>} : vector<8x64xf32>, vector<64x32xf32>, vector<8x32xf32> -> vector<8x32xf32>
    %c0_3 = arith.constant 0 : index
    %c0_4 = arith.constant 0 : index
    %3 = vector.load %arg2[%c0_3, %c0_4] : memref<8x1xf32, #tpu.memory_space<vmem>>, vector<8x1xf32>
    %4 = vector.broadcast %3 : vector<8x1xf32> to vector<8x32xf32>
    %5 = arith.mulf %2, %4 : vector<8x32xf32>
    %c0_5 = arith.constant 0 : index
    %c0_6 = arith.constant 0 : index
    %6 = vector.load %arg8[%c0_5, %c0_6] : memref<32x32xf32, #tpu.memory_space<vmem>>, vector<32x32xf32>
    %cst_7 = arith.constant dense<0.000000e+00> : vector<8x32xf32>
    %7 = tpu.matmul %5, %6, %cst_7 {dimension_numbers = #tpu.dot_dimension_numbers<[1], [0], [0], [1], [0, 0, 1, 1], [], []>, precision = #tpu.contract_precision<fp32>} : vector<8x32xf32>, vector<32x32xf32>, vector<8x32xf32> -> vector<8x32xf32>
    %c0_8 = arith.constant 0 : index
    %c0_9 = arith.constant 0 : index
    %8 = vector.load %arg9[%c0_8, %c0_9] : memref<32x72xf32, #tpu.memory_space<vmem>>, vector<32x72xf32>
    %cst_10 = arith.constant dense<0.000000e+00> : vector<64x72xf32>
    %9 = tpu.matmul %0, %8, %cst_10 {dimension_numbers = #tpu.dot_dimension_numbers<[1], [0], [0], [1], [0, 0, 1, 1], [], []>, precision = #tpu.contract_precision<fp32>} : vector<64x32xf32>, vector<32x72xf32>, vector<64x72xf32> -> vector<64x72xf32>
    %10 = vector.extract_strided_slice %9 {offsets = [0, 0], sizes = [64, 32], strides = [1, 1]} : vector<64x72xf32> to vector<64x32xf32>
    %11 = vector.extract_strided_slice %9 {offsets = [0, 32], sizes = [64, 32], strides = [1, 1]} : vector<64x72xf32> to vector<64x32xf32>
    %c0_11 = arith.constant 0 : index
    %c0_12 = arith.constant 0 : index
    %12 = vector.load %arg10[%c0_11, %c0_12] : memref<1x32xf32, #tpu.memory_space<vmem>>, vector<1x32xf32>
    %13 = vector.broadcast %12 : vector<1x32xf32> to vector<64x32xf32>
    %14 = arith.addf %11, %13 : vector<64x32xf32>
    %15 = arith.negf %14 : vector<64x32xf32>
    %16 = math.exp %15 : vector<64x32xf32>
    %cst_13 = arith.constant 1.000000e+00 : f32
    %17 = vector.broadcast %cst_13 : f32 to vector<64x32xf32>
    %18 = arith.addf %17, %16 : vector<64x32xf32>
    %19 = arith.divf %17, %18 : vector<64x32xf32>
    %20 = vector.extract_strided_slice %9 {offsets = [0, 64], sizes = [64, 8], strides = [1, 1]} : vector<64x72xf32> to vector<64x8xf32>
    %c0_14 = arith.constant 0 : index
    %c0_15 = arith.constant 0 : index
    %21 = vector.load %arg4[%c0_14, %c0_15] : memref<32x8xf32, #tpu.memory_space<vmem>>, vector<32x8xf32>
    %cst_16 = arith.constant dense<0.000000e+00> : vector<32x32xf32>
    %22 = tpu.matmul %21, %7, %cst_16 {dimension_numbers = #tpu.dot_dimension_numbers<[1], [0], [0], [1], [0, 0, 1, 1], [], []>, precision = #tpu.contract_precision<fp32>} : vector<32x8xf32>, vector<8x32xf32>, vector<32x32xf32> -> vector<32x32xf32>
    %c0_17 = arith.constant 0 : index
    %c0_18 = arith.constant 0 : index
    %23 = vector.load %arg5[%c0_17, %c0_18] : memref<32x32xf32, #tpu.memory_space<vmem>>, vector<32x32xf32>
    %24 = arith.mulf %22, %23 : vector<32x32xf32>
    %cst_19 = arith.constant dense<0.000000e+00> : vector<32x64xf32>
    %25 = tpu.matmul %24, %10, %cst_19 {dimension_numbers = #tpu.dot_dimension_numbers<[1], [1], [0], [0], [0, 0, 1, 0], [], []>, precision = #tpu.contract_precision<fp32>} : vector<32x32xf32>, vector<64x32xf32>, vector<32x64xf32> -> vector<32x64xf32>
    %c0_20 = arith.constant 0 : index
    %c0_21 = arith.constant 0 : index
    %26 = vector.load %arg3[%c0_20, %c0_21] : memref<32x64xf32, #tpu.memory_space<vmem>>, vector<32x64xf32>
    %27 = arith.addf %25, %26 : vector<32x64xf32>
    %cst_22 = arith.constant dense<0xFF800000> : vector<32xf32>
    %28 = vector.multi_reduction <maximumf>, %27, %cst_22 [1] : vector<32x64xf32> to vector<32xf32>
    %29 = vector.shape_cast %28 : vector<32xf32> to vector<32x1xf32>
    %30 = vector.broadcast %29 : vector<32x1xf32> to vector<32x64xf32>
    %31 = arith.subf %27, %30 : vector<32x64xf32>
    %32 = math.exp %31 : vector<32x64xf32>
    %cst_23 = arith.constant dense<0.000000e+00> : vector<32xf32>
    %33 = vector.multi_reduction <add>, %32, %cst_23 [1] : vector<32x64xf32> to vector<32xf32>
    %34 = vector.shape_cast %33 : vector<32xf32> to vector<32x1xf32>
    %35 = vector.broadcast %34 : vector<32x1xf32> to vector<32x64xf32>
    %36 = arith.divf %32, %35 : vector<32x64xf32>
    %cst_24 = arith.constant dense<0.000000e+00> : vector<32x8xf32>
    %37 = tpu.matmul %36, %20, %cst_24 {dimension_numbers = #tpu.dot_dimension_numbers<[1], [0], [0], [1], [0, 0, 1, 1], [], []>, precision = #tpu.contract_precision<fp32>} : vector<32x64xf32>, vector<64x8xf32>, vector<32x8xf32> -> vector<32x8xf32>
    %c0_25 = arith.constant 0 : index
    %c0_26 = arith.constant 0 : index
    %38 = vector.load %arg6[%c0_25, %c0_26] : memref<8x32xf32, #tpu.memory_space<vmem>>, vector<8x32xf32>
    %cst_27 = arith.constant dense<0.000000e+00> : vector<32x32xf32>
    %39 = tpu.matmul %37, %38, %cst_27 {dimension_numbers = #tpu.dot_dimension_numbers<[1], [0], [0], [1], [0, 0, 1, 1], [], []>, precision = #tpu.contract_precision<fp32>} : vector<32x8xf32>, vector<8x32xf32>, vector<32x32xf32> -> vector<32x32xf32>
    %c0_28 = arith.constant 0 : index
    %c0_29 = arith.constant 0 : index
    %40 = vector.load %arg5[%c0_28, %c0_29] : memref<32x32xf32, #tpu.memory_space<vmem>>, vector<32x32xf32>
    %41 = arith.mulf %39, %40 : vector<32x32xf32>
    %c0_30 = arith.constant 0 : index
    %c0_31 = arith.constant 0 : index
    %42 = vector.load %arg7[%c0_30, %c0_31] : memref<64x32xf32, #tpu.memory_space<vmem>>, vector<64x32xf32>
    %cst_32 = arith.constant dense<0.000000e+00> : vector<64x32xf32>
    %43 = tpu.matmul %42, %41, %cst_32 {dimension_numbers = #tpu.dot_dimension_numbers<[1], [0], [0], [1], [0, 0, 1, 1], [], []>, precision = #tpu.contract_precision<fp32>} : vector<64x32xf32>, vector<32x32xf32>, vector<64x32xf32> -> vector<64x32xf32>
    %44 = arith.mulf %19, %43 : vector<64x32xf32>
    %c0_33 = arith.constant 0 : index
    %c0_34 = arith.constant 0 : index
    %45 = vector.load %arg11[%c0_33, %c0_34] : memref<32x32xf32, #tpu.memory_space<vmem>>, vector<32x32xf32>
    %cst_35 = arith.constant dense<0.000000e+00> : vector<64x32xf32>
    %46 = tpu.matmul %44, %45, %cst_35 {dimension_numbers = #tpu.dot_dimension_numbers<[1], [0], [0], [1], [0, 0, 1, 1], [], []>, precision = #tpu.contract_precision<fp32>} : vector<64x32xf32>, vector<32x32xf32>, vector<64x32xf32> -> vector<64x32xf32>
    %c0_36 = arith.constant 0 : index
    %c0_37 = arith.constant 0 : index
    %47 = vector.load %arg12[%c0_36, %c0_37] : memref<1x32xf32, #tpu.memory_space<vmem>>, vector<1x32xf32>
    %48 = vector.broadcast %47 : vector<1x32xf32> to vector<64x32xf32>
    %49 = arith.addf %46, %48 : vector<64x32xf32>
    %c0_38 = arith.constant 0 : index
    %c0_39 = arith.constant 0 : index
    %50 = vector.load %arg13[%c0_38, %c0_39] : memref<64x32xf32, #tpu.memory_space<vmem>>, vector<64x32xf32>
    tpu.vector_store %arg13[%c0_38, %c0_39], %49 {strides = array<i32>} : memref<64x32xf32, #tpu.memory_space<vmem>>, vector<64x32xf32>,
    return
  }
}

</mosaic_0001>

<bundles_post_ra>
// kernel: global_attention.1
= control target key start
LH: loop header
LB: loop body
LE: loop exit
PB: predicated region body
PF: predicated region fallthrough
CT: control target
= control target key end

     0   :  { %v8514_v3 = vmov 0.0|0.0   ;;  %s9823_s0 = inlined_call_operand.vmem [shape: f32[64,32], index: 0, kind: input, shape index: {}]   ;;  %s9824_s1 = inlined_call_operand.vmem [shape: f32[8,64], index: 1, kind: input, shape index: {}]   ;;  %s9825_s2 = inlined_call_operand.vmem [shape: f32[8,1], index: 2, kind: input, shape index: {}]   ;;  %s9826_s3 = inlined_call_operand.vmem [shape: f32[32,64], index: 3, kind: input, shape index: {}]   ;;  %s9827_s4 = inlined_call_operand.vmem [shape: f32[32,8], index: 4, kind: input, shape index: {}]   ;;  %s9828_s5 = inlined_call_operand.vmem [shape: f32[32,32], index: 5, kind: input, shape index: {}]   ;;  %s9829_s6 = inlined_call_operand.vmem [shape: f32[8,32], index: 6, kind: input, shape index: {}]   ;;  %s9830_s7 = inlined_call_operand.vmem [shape: f32[64,32], index: 7, kind: input, shape index: {}]   ;;  %s9831_s8 = inlined_call_operand.vmem [shape: f32[32,32], index: 8, kind: input, shape index: {}]   ;;  %s9832_s9 = inlined_call_operand.vmem [shape: f32[32,72], index: 9, kind: input, shape index: {}]   ;;  %s9833_s10 = inlined_call_operand.vmem [shape: f32[1,32], index: 10, kind: input, shape index: {}]   ;;  %s9834_s11 = inlined_call_operand.vmem [shape: f32[32,32], index: 11, kind: input, shape index: {}]   ;;  %s9835_s12 = inlined_call_operand.vmem [shape: f32[1,32], index: 12, kind: input, shape index: {}]   ;;  %s9836_s13 = inlined_call_operand.hbm [shape: f32[64,32], index: 13, kind: output, shape index: {}]  }
   0x1   :  { %v8597_v0 = vld [vmem:[%s9823_s0] sm:$0xff]  ;;  %v8602_v1 = vld [vmem:[%s9823_s0 + $0x8] sm:$0xff]  ;;  %v8607_v2 = vld [vmem:[%s9823_s0 + $0x10] sm:$0xff]  ;;  %7751 = vmatprep.subr.bf16.mxu0 %v8514_v3  ;;  %7823 = vmatprep.subr.bf16.mxu1 %v8514_v3 }
   0x2   :  { %v59_v4 = vand.u32 4294901760, %v8597_v0  ;;  %v62_v5 = vand.u32 4294901760, %v8602_v1  ;;  %v8615_v6 = vld [vmem:[%s9823_s0 + $0x18] sm:$0xff]  ;;  %v65_v7 = vand.u32 4294901760, %v8607_v2  ;;  %v8621_v8 = vld [vmem:[%s9823_s0 + $0x20] sm:$0xff]  ;;  %v8628_v10 = vld [vmem:[%s9823_s0 + $0x28] sm:$0xff] }
   0x3   :  { %v68_v9 = vand.u32 4294901760, %v8615_v6 }
   0x4   :  { %v8630_v11 = vpack.c.bf16 %v62_v5, %v59_v4  ;;  %v8633_v12 = vsub.f32 %v8597_v0, %v59_v4 }
   0x5   :  { %18 = vsyncpa [#allocation3], 0  ;;  %v8636_v13 = vsub.f32 %v8602_v1, %v62_v5  ;;  %v8639_v14 = vsub.f32 %v8607_v2, %v65_v7  ;;  %v71_v15 = vand.u32 4294901760, %v8621_v8  ;;  %v8645_v16 = vld [vmem:[%s9823_s0 + $0x30] sm:$0xff]  ;;  %v8650_v17 = vld [vmem:[%s9823_s0 + $0x38] sm:$0xff]  ;;  %v8656_v19 = vpack.c.bf16 %v68_v9, %v65_v7  ;;  %s8518_s19 = smov 64  }
   0x6   :  { %v53_v18 = vld [vmem:[%s9824_s1] sm:$0xff]  ;;  %7753 = vmatpush3.bf16.msra.mxu0 %v8630_v11  ;;  %v8659_v20 = vsub.f32 %v8615_v6, %v68_v9  ;;  %v74_v21 = vand.u32 4294901760, %v8628_v10  ;;  %vm8515_vm0 = vmmov 0   ;;  %v8516_v22 = vmov 0.0   ;;  %s8519_s24 = smov 32   ;;  %s8520_s23 = smov 96  }
   0x7   :  { %7754 = vmatprep.subr.bf16.mxu0 %v8514_v3  ;;  %6867 = vmatprep.mubr.msk.f32.mxu0 %vm8515_vm0, %v8516_v22  ;;  %vm54_vm1 = vcmask 523264   ;;  %v144_v23 = vand.u32 4294901760, %v8633_v12  ;;  %v8667_v24 = vsub.f32 %v8621_v8, %v71_v15  ;;  %v77_v25 = vand.u32 4294901760, %v8645_v16  ;;  %v595_v53 = vld [vmem:[%s9825_s2] sm:$0xff] }
   0x8   :  { %v80_v26 = vand.u32 4294901760, %v8650_v17  ;;  %v56_v27 = vsel %vm54_vm1, %v53_v18, 0  ;;  %6973 = vmatprep.mubr.msk.f32.mxu1 %vm8515_vm0, %v8516_v22  ;;  %v8675_v28 = vsub.f32 %v8628_v10, %v74_v21  ;;  %v151_v30 = vand.u32 4294901760, %v8636_v13 }
   0x9   :  { %v8677_v29 = vand.u32 4294901760, %v56_v27  ;;  %v158_v31 = vand.u32 4294901760, %v8639_v14  ;;  %v8682_v32 = vpack.c.bf16 %v74_v21, %v71_v15  ;;  %v145_v33 = vsub.f32 %v8633_v12, %v144_v23 }
   0xa   :  { %7756 = vmatpush3.bf16.msra.mxu0 %v8656_v19  ;;  %v165_v34 = vand.u32 4294901760, %v8659_v20  ;;  %v152_v36 = vsub.f32 %v8636_v13, %v151_v30  ;;  %v8695_v37 = vpack.c.bf16 %v80_v26, %v77_v25  ;;  %v8698_v38 = vsub.f32 %v8645_v16, %v77_v25 }
   0xb   :  { %7757 = vmatprep.subr.bf16.mxu0 %v8514_v3  ;;  %v8690_v35 = vsub.f32 %v56_v27, %v8677_v29  ;;  %v159_v40 = vsub.f32 %v8639_v14, %v158_v31  ;;  %v172_v41 = vand.u32 4294901760, %v8667_v24  ;;  %v179_v42 = vand.u32 4294901760, %v8675_v28 }
   0xc   :  { %v8708_v43 = vsub.f32 %v8650_v17, %v80_v26  ;;  %v146_v44 = vand.u32 4294901760, %v145_v33  ;;  %v153_v45 = vand.u32 4294901760, %v152_v36  ;;  %v166_v46 = vsub.f32 %v8659_v20, %v165_v34 }
   0xd   :  { %v133_v39 = vand.u32 4294901760, %v8690_v35  ;;  %v186_v48 = vand.u32 4294901760, %v8698_v38  ;;  %v160_v50 = vand.u32 4294901760, %v159_v40  ;;  %v173_v51 = vsub.f32 %v8667_v24, %v172_v41 }
   0xe   :  { %7759 = vmatpush3.bf16.msra.mxu0 %v8682_v32  ;;  %v180_v52 = vsub.f32 %v8675_v28, %v179_v42  ;;  %v7764_v54 = vpack.c.bf16 %v153_v45, %v146_v44  ;;  %v167_v55 = vand.u32 4294901760, %v166_v46  ;;  %v193_v56 = vand.u32 4294901760, %v8708_v43 }
   0xf   :  { %7760 = vmatprep.subr.bf16.mxu0 %v8514_v3  ;;  %v134_v47 = vsub.f32 %v8690_v35, %v133_v39  ;;  %v8517_v57 = vmov 0   ;;  %v187_v58 = vsub.f32 %v8698_v38, %v186_v48  ;;  %v174_v60 = vand.u32 4294901760, %v173_v51 }
  0x10   :  { %8441 = vset.pattern.permute.xlu0 %v8517_v57  ;;  %v7767_v59 = vpack.c.bf16 %v167_v55, %v160_v50  ;;  %v181_v61 = vand.u32 4294901760, %v180_v52  ;;  %v194_v62 = vsub.f32 %v8708_v43, %v193_v56  ;;  %v7776_v9 = vpack.c.bf16 %v8636_v13, %v8633_v12  ;;  %v1097_v57 = vld [vmem:[%s9832_s9 + $0x10] sm:$0xff] }
  0x11   :  { %v135_v49 = vand.u32 4294901760, %v134_v47  ;;  %598 = vperm.xlu0 %8441, %v595_v53   ;;  %v188_v4 = vand.u32 4294901760, %v187_v58  ;;  %v7779_v15 = vpack.c.bf16 %v8659_v20, %v8639_v14  ;;  %v7782_v18 = vpack.c.bf16 %v8675_v28, %v8667_v24  ;;  %v603_v14 = vld [vmem:[%s9831_s8 + $0x8] sm:$0xff]  ;;  %v604_v28 = vld [vmem:[%s9831_s8 + $0x10] sm:$0xff]  ;;  %v1095_v53 = vld [vmem:[%s9832_s9] sm:$0xff] }
  0x12   :  { %7762 = vmatpush3.bf16.msra.mxu0 %v8695_v37  ;;  %v7770_v63 = vpack.c.bf16 %v181_v61, %v174_v60  ;;  %v195_v5 = vand.u32 4294901760, %v194_v62  ;;  %v7785_v21 = vpack.c.bf16 %v8708_v43, %v8698_v38  ;;  %v7800_v25 = vpack.c.bf16 %v151_v30, %v144_v23  ;;  %v1098_v58 = vld [vmem:[%s9832_s9 + $0x18] sm:$0xff] }
  0x13   :  { %7763 = vmatprep.subr.bf16.mxu0 %v8514_v3  ;;  %v7803_v26 = vpack.c.bf16 %v165_v34, %v158_v31  ;;  %v7806_v12 = vpack.c.bf16 %v179_v42, %v172_v41  ;;  %v7809_v13 = vpack.c.bf16 %v193_v56, %v186_v48  ;;  %v617_v30 = vand.u32 4294901760, %v604_v28 }
  0x14   :  { %v7773_v7 = vpack.c.bf16 %v195_v5, %v188_v4  ;;  %v1124_v55 = vand.u32 4294901760, %v1095_v53  ;;  %v1130_v61 = vand.u32 4294901760, %v1097_v57  ;;  %v1133_v62 = vand.u32 4294901760, %v1098_v58 }
  0x15   :  { %6868 = vmatmul.mubr.f32.vlgmr.msra.gmra.mrb[0].mxu0 %v135_v49  ;;  %vm606_vm2 = vcmask 261120   ;;  %vm1978_vm3 = vcmask 64512  }
  0x16   :  { %7765 = vmatpush3.bf16.msra.mxu0 %v7764_v54  ;;  %6886 = vmatprep.mubr.msk.f32.mxu0 %vm8515_vm0, %v8516_v22  ;;  %v1096_v54 = vld [vmem:[%s9832_s9 + $0x8] sm:$0xff]  ;;  %v1288_v4 = vsub.f32 %v1097_v57, %v1130_v61  ;;  %v1295_v5 = vsub.f32 %v1098_v58, %v1133_v62  ;;  %v1118_v58 = vsel %vm606_vm2, %v8645_v16, 0 }
  0x17   :  { %7766 = vmatprep.subr.bf16.mxu0 %v8514_v3  ;;  %v1127_v56 = vand.u32 4294901760, %v1096_v54 }
  0x19   :  { %v1281_v60 = vsub.f32 %v1096_v54, %v1127_v56 }
  0x1a   :  { %7768 = vmatpush3.bf16.msra.mxu0 %v7767_v59  ;;  %v1274_v59 = vsub.f32 %v1095_v53, %v1124_v55 }
  0x1b   :  { %7769 = vmatprep.subr.bf16.mxu0 %v8514_v3 }
  0x1e   :  { %7771 = vmatpush3.bf16.msra.mxu0 %v7770_v63  ;;  %v8859_v63 = vpack.c.bf16 %v1281_v60, %v1274_v59 }
  0x1f   :  { %7772 = vmatprep.subr.bf16.mxu0 %v8514_v3 }
  0x22   :  { %7774 = vmatpush3.bf16.msra.mxu0 %v7773_v7  ;;  %v8861_v7 = vpack.c.bf16 %v1295_v5, %v1288_v4 }
  0x23   :  { %7775 = vmatprep.subr.bf16.mxu0 %v8514_v3 }
  0x25   :  { %6887 = vmatmul.mubr.f32.vlgmr.msra.gmra.mrb[0].mxu0 %v8677_v29 }
  0x26   :  { %7777 = vmatpush3.bf16.msra.mxu0 %v7776_v9  ;;  %6905 = vmatprep.mubr.msk.f32.mxu0 %vm8515_vm0, %v8516_v22  ;;  %v1275_v9 = vand.u32 4294901760, %v1274_v59 }
  0x27   :  { %7778 = vmatprep.subr.bf16.mxu0 %v8514_v3 }
  0x2a   :  { %7780 = vmatpush3.bf16.msra.mxu0 %v7779_v15  ;;  %v1282_v15 = vand.u32 4294901760, %v1281_v60 }
  0x2b   :  { %7781 = vmatprep.subr.bf16.mxu0 %v8514_v3 }
  0x2e   :  { %7783 = vmatpush3.bf16.msra.mxu0 %v7782_v18  ;;  %v1276_v18 = vsub.f32 %v1274_v59, %v1275_v9 }
  0x2f   :  { %7784 = vmatprep.subr.bf16.mxu0 %v8514_v3 }
  0x32   :  { %7786 = vmatpush3.bf16.msra.mxu0 %v7785_v21  ;;  %v1283_v21 = vsub.f32 %v1281_v60, %v1282_v15 }
  0x33   :  { %7787 = vmatprep.subr.bf16.mxu0 %v8514_v3 }
  0x35   :  { %6906 = vmatmul.mubr.f32.vlgmr.msra.gmra.mrb[0].mxu0 %v8690_v35  ;;  %v8823_v35 = vsub.f32 %v604_v28, %v617_v30 }
  0x36   :  { %7789 = vmatpush3.bf16.msra.mxu0 %v8630_v11  ;;  %6924 = vmatprep.mubr.msk.f32.mxu0 %vm8515_vm0, %v8516_v22 }
  0x37   :  { %7790 = vmatprep.subr.bf16.mxu0 %v8514_v3  ;;  %v706_v40 = vand.u32 4294901760, %v8823_v35 }
  0x39   :  { %v707_v43 = vsub.f32 %v8823_v35, %v706_v40 }
  0x3a   :  { %7792 = vmatpush3.bf16.msra.mxu0 %v8656_v19 }
  0x3b   :  { %7793 = vmatprep.subr.bf16.mxu0 %v8514_v3  ;;  %v708_v46 = vand.u32 4294901760, %v707_v43 }
  0x3e   :  { %7795 = vmatpush3.bf16.msra.mxu0 %v8682_v32 }
  0x3f   :  { %7796 = vmatprep.subr.bf16.mxu0 %v8514_v3 }
  0x42   :  { %7798 = vmatpush3.bf16.msra.mxu0 %v8695_v37 }
  0x43   :  { %7799 = vmatprep.subr.bf16.mxu0 %v8514_v3 }
  0x45   :  { %6925 = vmatmul.mubr.f32.vlgmr.msra.gmra.mrb[0].mxu0 %v133_v39 }
  0x46   :  { %7801 = vmatpush3.bf16.msra.mxu0 %v7800_v25  ;;  %6943 = vmatprep.mubr.msk.f32.mxu0 %vm8515_vm0, %v8516_v22  ;;  %v8863_v25 = vpack.c.bf16 %v1127_v56, %v1124_v55 }
  0x47   :  { %7802 = vmatprep.subr.bf16.mxu0 %v8514_v3 }
  0x4a   :  { %7804 = vmatpush3.bf16.msra.mxu0 %v7803_v26  ;;  %v1277_v26 = vand.u32 4294901760, %v1276_v18 }
  0x4b   :  { %7805 = vmatprep.subr.bf16.mxu0 %v8514_v3 }
  0x4e   :  { %7807 = vmatpush3.bf16.msra.mxu0 %v7806_v12  ;;  %v1284_v12 = vand.u32 4294901760, %v1283_v21 }
  0x4f   :  { %7808 = vmatprep.subr.bf16.mxu0 %v8514_v3 }
  0x52   :  { %7810 = vmatpush3.bf16.msra.mxu0 %v7809_v13  ;;  %v8867_v13 = vpack.c.bf16 %v1133_v62, %v1130_v61  ;;  %v1121_v61 = vsel %vm606_vm2, %v8650_v17, 0 }
  0x53   :  { %7811 = vmatprep.subr.bf16.mxu0 %v8514_v3  ;;  %v8946_v21 = vand.u32 4294901760, %v1121_v61 }
  0x55   :  { %6944 = vmatmul.mubr.f32.vlgmr.msra.gmra.mrb[0].mxu0 %v8677_v29 }
  0x56   :  { %7813 = vmatpush3.bf16.msra.mxu0 %v8630_v11  ;;  %6962 = vmatprep.mubr.msk.f32.mxu0 %vm8515_vm0, %v8516_v22  ;;  %v602_v11 = vld [vmem:[%s9831_s8] sm:$0xff] }
  0x57   :  { %7814 = vmatprep.subr.bf16.mxu0 %v8514_v3  ;;  %v611_v20 = vand.u32 4294901760, %v602_v11 }
  0x59   :  { %v8807_v24 = vsub.f32 %v602_v11, %v611_v20  ;;  %v8869_v11 = vpack.c.bf16 %v1284_v12, %v1277_v26 }
  0x5a   :  { %7816 = vmatpush3.bf16.msra.mxu0 %v8656_v19  ;;  %v614_v19 = vand.u32 4294901760, %v603_v14 }
  0x5b   :  { %7817 = vmatprep.subr.bf16.mxu0 %v8514_v3 }
  0x5c   :  { %v8805_v23 = vpack.c.bf16 %v614_v19, %v611_v20  ;;  %v8809_v27 = vsub.f32 %v603_v14, %v614_v19  ;;  %v1100_v14 = vsel %vm606_vm2, %v8597_v0, 0  ;;  %v1103_v20 = vsel %vm606_vm2, %v8602_v1, 0 }
  0x5d   :  { %v8878_v19 = vand.u32 4294901760, %v1100_v14  ;;  %v8880_v28 = vand.u32 4294901760, %v1103_v20 }
  0x5e   :  { %7819 = vmatpush3.bf16.msra.mxu0 %v8682_v32  ;;  %7825 = vmatpush3.bf16.msra.mxu1 %v8805_v23  ;;  %v692_v32 = vand.u32 4294901760, %v8807_v24  ;;  %v699_v33 = vand.u32 4294901760, %v8809_v27  ;;  %v7836_v49 = vpack.c.bf16 %v8809_v27, %v8807_v24 }
  0x5f   :  { %7820 = vmatprep.subr.bf16.mxu0 %v8514_v3  ;;  %7826 = vmatprep.subr.bf16.mxu1 %v8514_v3  ;;  %v8892_v0 = vsub.f32 %v1103_v20, %v8880_v28 }
  0x60   :  { %v700_v38 = vsub.f32 %v8809_v27, %v699_v33  ;;  %v8843_v51 = vpack.c.bf16 %v699_v33, %v692_v32  ;;  %v8887_v33 = vsub.f32 %v1100_v14, %v8878_v19 }
  0x62   :  { %7822 = vmatpush3.bf16.msra.mxu0 %v8695_v37  ;;  %v693_v37 = vsub.f32 %v8807_v24, %v692_v32  ;;  %v701_v42 = vand.u32 4294901760, %v700_v38  ;;  %v1109_v32 = vsel %vm606_vm2, %v8615_v6, 0  ;;  %v1204_v6 = vand.u32 4294901760, %v8892_v0 }
  0x63   :  { %7860 = vmatprep.subr.bf16.mxu0 %v8863_v25 }
  0x64   :  { %v694_v39 = vand.u32 4294901760, %v693_v37  ;;  %v8889_v37 = vpack.c.bf16 %v1282_v15, %v1275_v9  ;;  %v8942_v15 = vand.u32 4294901760, %v1118_v58 }
  0x65   :  { %6963 = vmatmul.mubr.f32.vlgmr.msra.gmra.mrb[0].mxu0 %v8677_v29  ;;  %v605_v29 = vld [vmem:[%s9831_s8 + $0x18] sm:$0xff] }
  0x66   :  { %v620_v31 = vand.u32 4294901760, %v605_v29  ;;  %v8835_v45 = vpack.c.bf16 %v701_v42, %v694_v39  ;;  %7862 = vmatpush3.bf16.msra.mxu0 %v8863_v25  ;;  %v1115_v42 = vsel %vm606_vm2, %v8628_v10, 0  ;;  %v8951_v14 = vsub.f32 %v1118_v58, %v8942_v15 }
  0x67   :  { %7864 = vmatprep.subr.bf16.mxu0 %v8867_v13  ;;  %v8921_v57 = vand.u32 4294901760, %v1115_v42 }
  0x68   :  { %v8821_v34 = vpack.c.bf16 %v620_v31, %v617_v30  ;;  %v8825_v36 = vsub.f32 %v605_v29, %v620_v31  ;;  %v1289_v29 = vand.u32 4294901760, %v1288_v4  ;;  %v1296_v30 = vand.u32 4294901760, %v1295_v5 }
  0x69   :  { %v1106_v31 = vsel %vm606_vm2, %v8607_v2, 0  ;;  %v1112_v2 = vsel %vm606_vm2, %v8621_v8, 0  ;;  %v1205_v8 = vsub.f32 %v8892_v0, %v1204_v6  ;;  %v8937_v9 = vsub.f32 %v1115_v42, %v8921_v57 }
  0x6a   :  { %7828 = vmatpush3.bf16.msra.mxu1 %v8821_v34  ;;  %v713_v41 = vand.u32 4294901760, %v8825_v36  ;;  %v7839_v50 = vpack.c.bf16 %v8825_v36, %v8823_v35  ;;  %7866 = vmatpush3.bf16.msra.mxu0 %v8867_v13  ;;  %v1290_v1 = vsub.f32 %v1288_v4, %v1289_v29  ;;  %v1297_v38 = vsub.f32 %v1295_v5, %v1296_v30 }
  0x6b   :  { %7829 = vmatprep.subr.bf16.mxu1 %v8514_v3  ;;  %7868 = vmatprep.subr.bf16.mxu0 %v8869_v11  ;;  %v8894_v39 = vand.u32 4294901760, %v1106_v31  ;;  %v8918_v55 = vand.u32 4294901760, %v1112_v2  ;;  %v1206_v60 = vand.u32 4294901760, %v1205_v8  ;;  %v1244_v26 = vand.u32 4294901760, %v8937_v9 }
  0x6c   :  { %v714_v44 = vsub.f32 %v8825_v36, %v713_v41  ;;  %v8845_v52 = vpack.c.bf16 %v713_v41, %v706_v40  ;;  %v1194_v40 = vand.u32 4294901760, %v8887_v33  ;;  %v8897_v41 = vand.u32 4294901760, %v1109_v32 }
  0x6d   :  { %v8905_v43 = vsub.f32 %v1106_v31, %v8894_v39  ;;  %v1298_v53 = vand.u32 4294901760, %v1297_v38  ;;  %v8929_v62 = vsub.f32 %v1112_v2, %v8918_v55  ;;  %v1254_v31 = vand.u32 4294901760, %v8951_v14 }
  0x6e   :  { %v715_v47 = vand.u32 4294901760, %v714_v44  ;;  %v8907_v44 = vpack.c.bf16 %v1296_v30, %v1289_v29  ;;  %v8913_v54 = vsub.f32 %v1109_v32, %v8897_v41  ;;  %v8957_v29 = vsub.f32 %v1121_v61, %v8946_v21 }
  0x6f   :  { %v1214_v10 = vand.u32 4294901760, %v8905_v43  ;;  %v1234_v17 = vand.u32 4294901760, %v8929_v62  ;;  %v1245_v30 = vsub.f32 %v8937_v9, %v1244_v26  ;;  %v1255_v2 = vsub.f32 %v8951_v14, %v1254_v31 }
  0x70   :  { %v8837_v48 = vpack.c.bf16 %v715_v47, %v708_v46  ;;  %v1195_v46 = vsub.f32 %v8887_v33, %v1194_v40  ;;  %v1291_v47 = vand.u32 4294901760, %v1290_v1  ;;  %v1224_v59 = vand.u32 4294901760, %v8913_v54 }
  0x71   :  { %v1215_v4 = vsub.f32 %v8905_v43, %v1214_v10  ;;  %v1235_v20 = vsub.f32 %v8929_v62, %v1234_v17  ;;  %v1264_v1 = vand.u32 4294901760, %v8957_v29  ;;  %v1246_v38 = vand.u32 4294901760, %v1245_v30 }
  0x72   :  { %v1196_v56 = vand.u32 4294901760, %v1195_v46  ;;  %v8934_v5 = vpack.c.bf16 %v1298_v53, %v1291_v47  ;;  %v1225_v16 = vsub.f32 %v8913_v54, %v1224_v59  ;;  %v1256_v46 = vand.u32 4294901760, %v1255_v2 }
  0x73   :  { %v1216_v18 = vand.u32 4294901760, %v1215_v4  ;;  %v1236_v32 = vand.u32 4294901760, %v1235_v20  ;;  %v1265_v42 = vsub.f32 %v8957_v29, %v1264_v1 }
  0x74   :  { %7039 = vmatprep.mubr.f32.mxu0 %v1196_v56  ;;  %v1226_v12 = vand.u32 4294901760, %v1225_v16 }
  0x75   :  { %7040 = vmatmul.mubr.f32.vlgmr.msra.gmra.mrb[2].mxu0 %v1206_v60  ;;  %v1266_v47 = vand.u32 4294901760, %v1265_v42 }
  0x76   :  { %7870 = vmatpush3.bf16.msra.mxu0 %v8869_v11  ;;  %7042 = vmatprep.mubr.f32.mxu0 %v1216_v18 }
  0x77   :  { %7872 = vmatprep.subr.bf16.mxu0 %v8934_v5 }
  0x79   :  { %7043 = vmatmul.mubr.f32.gmra.mrb[4].mxu0 %v1226_v12 }
  0x7a   :  { %7874 = vmatpush3.bf16.msra.mxu0 %v8934_v5  ;;  %7045 = vmatprep.mubr.f32.mxu0 %v1236_v32 }
  0x7d   :  { %7046 = vmatmul.mubr.f32.gmra.mrb[6].mxu0 %v1246_v38 }
  0x7e   :  { %7048 = vmatprep.mubr.f32.mxu0 %v1256_v46 }
  0x81   :  { %7049 = vmatmul.mubr.f32.gmra.mrb[8].mxu0 %v1266_v47 }
  0x82   :  { %7059 = vmatprep.mubr.f32.mxu0 %v8878_v19 }
  0x85   :  { %7060 = vmatmul.mubr.f32.vlgmr.msra.gmra.mrb[2].mxu0 %v8880_v28 }
  0x90   :  { %v599_v53 = vpop.permute.xlu0 %598 }
 0x138   :  { %v591_v8 = vpop.f32.mrb[0].mxu0 }
 0x139   :  { %v601_v56 = vmul.f32 %v599_v53, %v591_v8  ;;  %v6964_v58 = vpop.f32.mrb[1].mxu0 }
 0x13b   :  { %v608_v60 = vsel %vm606_vm2, %v601_v56, 0 }
 0x13c   :  { %v679_v61 = vand.u32 4294901760, %v608_v60 }
 0x13e   :  { %v680_v4 = vsub.f32 %v608_v60, %v679_v61 }
 0x140   :  { %v681_v16 = vand.u32 4294901760, %v680_v4 }
 0x142   :  { %v682_v18 = vsub.f32 %v680_v4, %v681_v16 }
 0x144   :  { %v683_v12 = vand.u32 4294901760, %v682_v18 }
 0x146   :  { %6974 = vmatmul.mubr.f32.vlgmr.msra.gmra.mrb[0].mxu1 %v683_v12 }
 0x147   :  { %7831 = vmatpush3.bf16.msra.mxu1 %v8835_v45  ;;  %6984 = vmatprep.mubr.msk.f32.mxu1 %vm8515_vm0, %v8516_v22 }
 0x148   :  { %7832 = vmatprep.subr.bf16.mxu1 %v8514_v3 }
 0x14b   :  { %7834 = vmatpush3.bf16.msra.mxu1 %v8837_v48 }
 0x14c   :  { %7835 = vmatprep.subr.bf16.mxu1 %v8514_v3  ;;  %v9080_v36 = vpop.f32.mrb[4].mxu0 }
 0x14d   :  { %v9082_v45 = vpop.f32.mrb[5].mxu0 }
 0x14e   :  { %6985 = vmatmul.mubr.f32.vlgmr.msra.gmra.mrb[0].mxu1 %v679_v61 }
 0x14f   :  { %7837 = vmatpush3.bf16.msra.mxu1 %v7836_v49  ;;  %6995 = vmatprep.mubr.msk.f32.mxu1 %vm8515_vm0, %v8516_v22 }
 0x150   :  { %7838 = vmatprep.subr.bf16.mxu1 %v8514_v3  ;;  %v9084_v48 = vpop.f32.mrb[6].mxu0 }
 0x151   :  { %v9086_v49 = vpop.f32.mrb[7].mxu0 }
 0x153   :  { %7840 = vmatpush3.bf16.msra.mxu1 %v7839_v50 }
 0x154   :  { %7841 = vmatprep.subr.bf16.mxu1 %v8514_v3  ;;  %v9088_v50 = vpop.f32.mrb[8].mxu0 }
 0x156   :  { %6996 = vmatmul.mubr.f32.vlgmr.msra.gmra.mrb[0].mxu1 %v680_v4 }
 0x157   :  { %7843 = vmatpush3.bf16.msra.mxu1 %v8805_v23  ;;  %7006 = vmatprep.mubr.msk.f32.mxu1 %vm8515_vm0, %v8516_v22 }
 0x158   :  { %7844 = vmatprep.subr.bf16.mxu1 %v8514_v3 }
 0x15b   :  { %7846 = vmatpush3.bf16.msra.mxu1 %v8821_v34 }
 0x15c   :  { %7847 = vmatprep.subr.bf16.mxu1 %v8514_v3 }
 0x15e   :  { %7007 = vmatmul.mubr.f32.vlgmr.msra.gmra.mrb[0].mxu1 %v681_v16 }
 0x15f   :  { %7849 = vmatpush3.bf16.msra.mxu1 %v8843_v51  ;;  %7017 = vmatprep.mubr.msk.f32.mxu1 %vm8515_vm0, %v8516_v22  ;;  %v9090_v51 = vpop.f32.mrb[9].mxu0 }
 0x160   :  { %7850 = vmatprep.subr.bf16.mxu1 %v8514_v3 }
 0x163   :  { %7852 = vmatpush3.bf16.msra.mxu1 %v8845_v52  ;;  %v9092_v52 = vpop.f32.mrb[2].mxu0 }
 0x164   :  { %7853 = vmatprep.subr.bf16.mxu1 %v8514_v3 }
 0x166   :  { %7018 = vmatmul.mubr.f32.vlgmr.msra.gmra.mrb[0].mxu1 %v679_v61 }
 0x167   :  { %7855 = vmatpush3.bf16.msra.mxu1 %v8805_v23  ;;  %7028 = vmatprep.mubr.msk.f32.mxu1 %vm8515_vm0, %v8516_v22 }
 0x168   :  { %7856 = vmatprep.subr.bf16.mxu1 %v8514_v3  ;;  %v1974_v3 = vld [vmem:[%s9827_s4] sm:$0xff] }
 0x169   :  { %v1980_v22 = vsel %vm1978_vm3, %v1974_v3, 0 }
 0x16a   :  { %v9076_v23 = vand.u32 4294901760, %v1980_v22 }
 0x16b   :  { %7858 = vmatpush3.bf16.msra.mxu1 %v8821_v34 }
 0x16c   :  { %8195 = vmatprep.subr.bf16.mxu1 %v8869_v11  ;;  %v2058_v24 = vsub.f32 %v1980_v22, %v9076_v23 }
 0x16e   :  { %7029 = vmatmul.mubr.f32.vlgmr.msra.gmra.mrb[0].mxu1 %v679_v61  ;;  %v2059_v27 = vand.u32 4294901760, %v2058_v24 }
 0x16f   :  { %8197 = vmatpush3.bf16.msra.mxu1 %v8869_v11  ;;  %7062 = vmatprep.mubr.f32.mxu1 %v8894_v39 }
 0x170   :  { %8196 = vmatprep.subr.bf16.mxu1 %v8934_v5  ;;  %v2060_v34 = vsub.f32 %v2058_v24, %v2059_v27 }
 0x172   :  { %v2061_v35 = vand.u32 4294901760, %v2060_v34 }
 0x173   :  { %8198 = vmatpush3.bf16.msra.mxu1 %v8934_v5 }
 0x174   :  { %7876 = vmatprep.subr.bf16.mxu1 %v8859_v63  ;;  %7153 = vmatprep.mubr.f32.mxu0 %v2061_v35 }
 0x176   :  { %7063 = vmatmul.mubr.f32.vlgmr.msra.gmra.mrb[2].mxu1 %v8897_v41 }
 0x177   :  { %7065 = vmatprep.mubr.f32.mxu1 %v8918_v55  ;;  %7878 = vmatpush3.bf16.msra.mxu1 %v8859_v63  ;;  %v9094_v63 = vpop.f32.mrb[3].mxu0 }
 0x178   :  { %7880 = vmatprep.subr.bf16.mxu1 %v8861_v7 }
 0x17a   :  { %7066 = vmatmul.mubr.f32.gmra.mrb[4].mxu1 %v8921_v57 }
 0x17b   :  { %7068 = vmatprep.mubr.f32.mxu1 %v8942_v15  ;;  %7882 = vmatpush3.bf16.msra.mxu1 %v8861_v7  ;;  %v1975_v7 = vld [vmem:[%s9827_s4 + $0x8] sm:$0xff] }
 0x17c   :  { %7884 = vmatprep.subr.bf16.mxu1 %v8863_v25 }
 0x17e   :  { %7069 = vmatmul.mubr.f32.gmra.mrb[6].mxu1 %v8946_v21 }
 0x17f   :  { %7079 = vmatprep.mubr.f32.mxu1 %v8887_v33 }
 0x182   :  { %7080 = vmatmul.mubr.f32.vlgmr.msra.gmra.mrb[8].mxu1 %v8892_v0 }
 0x183   :  { %7082 = vmatprep.mubr.f32.mxu1 %v8905_v43  ;;  %7886 = vmatpush3.bf16.msra.mxu1 %v8863_v25 }
 0x184   :  { %7888 = vmatprep.subr.bf16.mxu1 %v8867_v13 }
 0x186   :  { %7083 = vmatmul.mubr.f32.gmra.mrb[2].mxu1 %v8913_v54 }
 0x187   :  { %7085 = vmatprep.mubr.f32.mxu1 %v8929_v62  ;;  %7890 = vmatpush3.bf16.msra.mxu1 %v8867_v13 }
 0x188   :  { %7892 = vmatprep.subr.bf16.mxu1 %v8889_v37 }
 0x18a   :  { %7086 = vmatmul.mubr.f32.gmra.mrb[4].mxu1 %v8937_v9 }
 0x18b   :  { %7088 = vmatprep.mubr.f32.mxu1 %v8951_v14 }
 0x18e   :  { %7089 = vmatmul.mubr.f32.gmra.mrb[6].mxu1 %v8957_v29 }
 0x18f   :  { %7099 = vmatprep.mubr.f32.mxu1 %v1194_v40 }
 0x192   :  { %7100 = vmatmul.mubr.f32.vlgmr.msra.gmra.mrb[8].mxu1 %v1204_v6 }
 0x193   :  { %7102 = vmatprep.mubr.f32.mxu1 %v1214_v10  ;;  %7894 = vmatpush3.bf16.msra.mxu1 %v8889_v37 }
 0x194   :  { %7896 = vmatprep.subr.bf16.mxu1 %v8907_v44 }
 0x196   :  { %7103 = vmatmul.mubr.f32.gmra.mrb[2].mxu1 %v1224_v59 }
 0x197   :  { %7105 = vmatprep.mubr.f32.mxu1 %v1234_v17  ;;  %7898 = vmatpush3.bf16.msra.mxu1 %v8907_v44 }
 0x198   :  { %7900 = vmatprep.subr.bf16.mxu1 %v8863_v25 }
 0x19a   :  { %7106 = vmatmul.mubr.f32.gmra.mrb[4].mxu1 %v1244_v26 }
 0x19b   :  { %7108 = vmatprep.mubr.f32.mxu1 %v1254_v31 }
 0x19e   :  { %7109 = vmatmul.mubr.f32.gmra.mrb[6].mxu1 %v1264_v1 }
 0x19f   :  { %7119 = vmatprep.mubr.f32.mxu1 %v8878_v19 }
 0x1a2   :  { %7120 = vmatmul.mubr.f32.vlgmr.msra.gmra.mrb[8].mxu1 %v8880_v28 }
 0x1a3   :  { %7122 = vmatprep.mubr.f32.mxu1 %v8894_v39  ;;  %7902 = vmatpush3.bf16.msra.mxu1 %v8863_v25  ;;  %v1976_v25 = vld [vmem:[%s9827_s4 + $0x10] sm:$0xff] }
 0x1a4   :  { %7904 = vmatprep.subr.bf16.mxu1 %v8867_v13  ;;  %v1986_v11 = vsel %vm1978_vm3, %v1976_v25, 0 }
 0x1a5   :  { %v2077_v33 = vand.u32 4294901760, %v1986_v11 }
 0x1a6   :  { %7123 = vmatmul.mubr.f32.gmra.mrb[2].mxu1 %v8897_v41 }
 0x1a7   :  { %7125 = vmatprep.mubr.f32.mxu1 %v8918_v55  ;;  %7906 = vmatpush3.bf16.msra.mxu1 %v8867_v13  ;;  %v1983_v13 = vsel %vm1978_vm3, %v1975_v7, 0  ;;  %v2078_v40 = vsub.f32 %v1986_v11, %v2077_v33 }
 0x1a9   :  { %v2079_v43 = vand.u32 4294901760, %v2078_v40 }
 0x1aa   :  { %7126 = vmatmul.mubr.f32.gmra.mrb[4].mxu1 %v8921_v57 }
 0x1ab   :  { %7128 = vmatprep.mubr.f32.mxu1 %v8942_v15 }
 0x1ae   :  { %7129 = vmatmul.mubr.f32.gmra.mrb[6].mxu1 %v8946_v21 }
 0x1af   :  { %7139 = vmatprep.mubr.f32.mxu1 %v8878_v19  ;;  %v1977_v19 = vld [vmem:[%s9827_s4 + $0x18] sm:$0xff] }
 0x1b0   :  { %v1989_v37 = vsel %vm1978_vm3, %v1977_v19, 0 }
 0x1b2   :  { %7140 = vmatmul.mubr.f32.vlgmr.msra.gmra.mrb[8].mxu1 %v8880_v28  ;;  %v2067_v28 = vand.u32 4294901760, %v1983_v13 }
 0x1b3   :  { %7142 = vmatprep.mubr.f32.mxu1 %v8894_v39  ;;  %v2087_v39 = vand.u32 4294901760, %v1989_v37 }
 0x1b4   :  { %v2068_v0 = vsub.f32 %v1983_v13, %v2067_v28 }
 0x1b5   :  { %v2088_v6 = vsub.f32 %v1989_v37, %v2087_v39 }
 0x1b6   :  { %7143 = vmatmul.mubr.f32.gmra.mrb[2].mxu1 %v8897_v41  ;;  %v2069_v41 = vand.u32 4294901760, %v2068_v0 }
 0x1b7   :  { %7145 = vmatprep.mubr.f32.mxu1 %v8918_v55  ;;  %v2089_v54 = vand.u32 4294901760, %v2088_v6  ;;  %v2080_v55 = vsub.f32 %v2078_v40, %v2079_v43 }
 0x1b8   :  { %v2070_v44 = vsub.f32 %v2068_v0, %v2069_v41 }
 0x1b9   :  { %v2090_v5 = vsub.f32 %v2088_v6, %v2089_v54  ;;  %v2081_v9 = vand.u32 4294901760, %v2080_v55 }
 0x1ba   :  { %7146 = vmatmul.mubr.f32.gmra.mrb[4].mxu1 %v8921_v57  ;;  %v2071_v62 = vand.u32 4294901760, %v2070_v44 }
 0x1bb   :  { %7148 = vmatprep.mubr.f32.mxu1 %v8942_v15  ;;  %v2091_v17 = vand.u32 4294901760, %v2090_v5 }
 0x1be   :  { %7149 = vmatmul.mubr.f32.gmra.mrb[6].mxu1 %v8946_v21 }
 0x241   :  { %v1091_v10 = vpop.f32.mrb[0].mxu1 }
 0x242   :  { %v1992_v57 = vand.u32 4294901760, %v1091_v10  ;;  %v7030_v59 = vpop.f32.mrb[1].mxu1 }
 0x244   :  { %v2099_v15 = vsub.f32 %v1091_v10, %v1992_v57  ;;  %7151 = vmatprep.subr.mxu0 %v1992_v57 }
 0x245   :  { %7152 = vmatpush3.msra.mxu0 %v1992_v57 }
 0x246   :  { %7154 = vmatmul.mubr.f32.vlgmr.msra.gmra.mrb[10].mxu0 %v2071_v62  ;;  %v2100_v21 = vand.u32 4294901760, %v2099_v15 }
 0x247   :  { %7156 = vmatprep.mubr.f32.mxu0 %v2081_v9 }
 0x248   :  { %v2101_v26 = vsub.f32 %v2099_v15, %v2100_v21 }
 0x24a   :  { %7157 = vmatmul.mubr.f32.gmra.mrb[12].mxu0 %v2091_v17  ;;  %v2102_v14 = vand.u32 4294901760, %v2101_v26 }
 0x24b   :  { %7161 = vmatprep.mubr.f32.mxu0 %v9076_v23 }
 0x24c   :  { %7159 = vmatprep.subr.mxu0 %v2102_v14 }
 0x24d   :  { %7160 = vmatpush3.msra.mxu0 %v2102_v14 }
 0x24e   :  { %7162 = vmatmul.mubr.f32.vlgmr.msra.gmra.mrb[10].mxu0 %v2067_v28  ;;  %7167 = vmatprep.subr.mxu0 %v2099_v15 }
 0x24f   :  { %7168 = vmatpush3.msra.mxu0 %v2099_v15  ;;  %7164 = vmatprep.mubr.f32.mxu0 %v2077_v33 }
 0x250   :  { %7175 = vmatprep.subr.mxu0 %v1992_v57 }
 0x252   :  { %7165 = vmatmul.mubr.f32.gmra.mrb[12].mxu0 %v2087_v39 }
 0x253   :  { %7169 = vmatprep.mubr.f32.mxu0 %v2058_v24 }
 0x256   :  { %7170 = vmatmul.mubr.f32.vlgmr.msra.gmra.mrb[10].mxu0 %v2068_v0 }
 0x257   :  { %7176 = vmatpush3.msra.mxu0 %v1992_v57  ;;  %7172 = vmatprep.mubr.f32.mxu0 %v2078_v40 }
 0x258   :  { %7183 = vmatprep.subr.mxu0 %v2100_v21 }
 0x25a   :  { %7173 = vmatmul.mubr.f32.gmra.mrb[12].mxu0 %v2088_v6 }
 0x25b   :  { %7177 = vmatprep.mubr.f32.mxu0 %v2059_v27 }
 0x25e   :  { %7178 = vmatmul.mubr.f32.vlgmr.msra.gmra.mrb[10].mxu0 %v2069_v41 }
 0x25f   :  { %7184 = vmatpush3.msra.mxu0 %v2100_v21  ;;  %7180 = vmatprep.mubr.f32.mxu0 %v2079_v43 }
 0x260   :  { %7191 = vmatprep.subr.mxu0 %v1992_v57 }
 0x262   :  { %7181 = vmatmul.mubr.f32.gmra.mrb[12].mxu0 %v2089_v54 }
 0x263   :  { %7185 = vmatprep.mubr.f32.mxu0 %v9076_v23 }
 0x266   :  { %7186 = vmatmul.mubr.f32.vlgmr.msra.gmra.mrb[10].mxu0 %v2067_v28 }
 0x267   :  { %7192 = vmatpush3.msra.mxu0 %v1992_v57  ;;  %7188 = vmatprep.mubr.f32.mxu0 %v2077_v33 }
 0x26a   :  { %7189 = vmatmul.mubr.f32.gmra.mrb[12].mxu0 %v2087_v39 }
 0x26b   :  { %7193 = vmatprep.mubr.f32.mxu0 %v9076_v23 }
 0x26e   :  { %7194 = vmatmul.mubr.f32.vlgmr.msra.gmra.mrb[10].mxu0 %v2067_v28 }
 0x26f   :  { %7196 = vmatprep.mubr.f32.mxu0 %v2077_v33 }
 0x272   :  { %7197 = vmatmul.mubr.f32.gmra.mrb[12].mxu0 %v2087_v39 }
 0x285   :  { %v7141_v20 = vpop.f32.mrb[8].mxu1 }
 0x286   :  { %v9112_v29 = vadd.f32 %v7141_v20, %v9092_v52  ;;  %v1863_v30 = vpop.f32.mrb[9].mxu1 }
 0x287   :  { %v9115_v31 = vadd.f32 %v1863_v30, %v9094_v63 }
 0x288   :  { %v2594_v32 = vsel %vm606_vm2, %v9112_v29, 0 }
 0x289   :  { %v2618_v1 = vand.u32 4294901760, %v2594_v32  ;;  %v2591_v38 = vsel %vm606_vm2, %v9115_v31, 0  ;;  %v7144_v2 = vpop.f32.mrb[2].mxu1 }
 0x28a   :  { %v2615_v42 = vand.u32 4294901760, %v2591_v38  ;;  %v9122_v46 = vadd.f32 %v7144_v2, %v9080_v36  ;;  %v1875_v47 = vpop.f32.mrb[3].mxu1 }
 0x28b   :  { %v9125_v53 = vadd.f32 %v1875_v47, %v9082_v45  ;;  %v2736_v8 = vsub.f32 %v2594_v32, %v2618_v1 }
 0x28c   :  { %v9127_v56 = vpack.c.bf16 %v2618_v1, %v2615_v42  ;;  %v2729_v58 = vsub.f32 %v2591_v38, %v2615_v42  ;;  %v2600_v60 = vsel %vm606_vm2, %v9122_v46, 0 }
 0x28d   :  { %v2624_v61 = vand.u32 4294901760, %v2600_v60  ;;  %v2597_v4 = vsel %vm606_vm2, %v9125_v53, 0  ;;  %v7147_v16 = vpop.f32.mrb[4].mxu1  ;;  %v2737_v25 = vand.u32 4294901760, %v2736_v8 }
 0x28e   :  { %v2621_v18 = vand.u32 4294901760, %v2597_v4  ;;  %7908 = vmatprep.subr.bf16.mxu1 %v9127_v56  ;;  %v9135_v12 = vadd.f32 %v7147_v16, %v9084_v48  ;;  %v1887_v3 = vpop.f32.mrb[5].mxu1  ;;  %v9137_v22 = vpack.c.bf16 %v2736_v8, %v2729_v58  ;;  %v2730_v40 = vand.u32 4294901760, %v2729_v58 }
 0x28f   :  { %v2750_v23 = vsub.f32 %v2600_v60, %v2624_v61  ;;  %7910 = vmatpush3.bf16.xpose.msra.mxu1 %v9127_v56  ;;  %v9141_v24 = vadd.f32 %v1887_v3, %v9086_v49  ;;  %v2738_v38 = vsub.f32 %v2736_v8, %v2737_v25  ;;  %v9188_v8 = vld [vmem:[%s9828_s5 + $0x8] sm:$0xff] }
 0x290   :  { %v9143_v27 = vpack.c.bf16 %v2624_v61, %v2621_v18  ;;  %v2743_v34 = vsub.f32 %v2597_v4, %v2621_v18  ;;  %v2606_v35 = vsel %vm606_vm2, %v9135_v12, 0  ;;  %v9167_v59 = vpack.c.bf16 %v2737_v25, %v2730_v40 }
 0x291   :  { %v2630_v36 = vand.u32 4294901760, %v2606_v35  ;;  %v2603_v45 = vsel %vm606_vm2, %v9141_v24, 0  ;;  %v7150_v48 = vpop.f32.mrb[6].mxu1  ;;  %v2751_v52 = vand.u32 4294901760, %v2750_v23  ;;  %v2731_v1 = vsub.f32 %v2729_v58, %v2730_v40  ;;  %v9193_v58 = vld [vmem:[%s9828_s5] sm:$0xff] }
 0x292   :  { %v2627_v63 = vand.u32 4294901760, %v2603_v45  ;;  %7912 = vmatprep.subr.bf16.mxu1 %v9143_v27  ;;  %v9151_v7 = vadd.f32 %v7150_v48, %v9088_v50  ;;  %v1899_v49 = vpop.f32.mrb[7].mxu1  ;;  %v2744_v13 = vand.u32 4294901760, %v2743_v34  ;;  %v9156_v33 = vpack.c.bf16 %v2750_v23, %v2743_v34 }
 0x293   :  { %v2764_v11 = vsub.f32 %v2606_v35, %v2630_v36  ;;  %v9154_v19 = vadd.f32 %v1899_v49, %v9090_v51  ;;  %v2752_v28 = vsub.f32 %v2750_v23, %v2751_v52  ;;  %v2732_v18 = vand.u32 4294901760, %v2731_v1  ;;  %v9206_v49 = vld [vmem:[%s9828_s5 + $0x10] sm:$0xff] }
 0x294   :  { %v9158_v37 = vpack.c.bf16 %v2630_v36, %v2627_v63  ;;  %v2757_v0 = vsub.f32 %v2603_v45, %v2627_v63  ;;  %v2612_v39 = vsel %vm606_vm2, %v9151_v7, 0  ;;  %v2745_v6 = vsub.f32 %v2743_v34, %v2744_v13 }
 0x295   :  { %v2636_v41 = vand.u32 4294901760, %v2612_v39  ;;  %v2609_v50 = vsel %vm606_vm2, %v9154_v19, 0  ;;  %v2753_v43 = vand.u32 4294901760, %v2752_v28  ;;  %v2765_v51 = vand.u32 4294901760, %v2764_v11 }
 0x296   :  { %v2633_v44 = vand.u32 4294901760, %v2609_v50  ;;  %v2758_v54 = vand.u32 4294901760, %v2757_v0  ;;  %v9164_v55 = vpack.c.bf16 %v2764_v11, %v2757_v0  ;;  %v2746_v57 = vand.u32 4294901760, %v2745_v6 }
 0x297   :  { %7914 = vmatpush3.bf16.xpose.msra.mxu1 %v9143_v27  ;;  %v2778_v10 = vsub.f32 %v2612_v39, %v2636_v41  ;;  %v9169_v62 = vpack.c.bf16 %v2751_v52, %v2744_v13  ;;  %v2766_v15 = vsub.f32 %v2764_v11, %v2765_v51  ;;  %v2739_v3 = vand.u32 4294901760, %v2738_v38  ;;  %v9200_v52 = vld [vmem:[%s9828_s5 + $0x18] sm:$0xff] }
 0x298   :  { %v2771_v5 = vsub.f32 %v2609_v50, %v2633_v44  ;;  %7916 = vmatprep.subr.bf16.mxu1 %v9158_v37  ;;  %v2759_v9 = vsub.f32 %v2757_v0, %v2758_v54  ;;  %v9172_v17 = vpack.c.bf16 %v2753_v43, %v2746_v57  ;;  %v9174_v26 = vpack.c.bf16 %v2765_v51, %v2758_v54 }
 0x299   :  { %v2779_v21 = vand.u32 4294901760, %v2778_v10  ;;  %v2767_v20 = vand.u32 4294901760, %v2766_v15  ;;  %v9178_v42 = vpack.c.bf16 %v2636_v41, %v2633_v44  ;;  %v7923_v34 = vpack.c.bf16 %v2739_v3, %v2732_v18 }
 0x29a   :  { %v2760_v14 = vand.u32 4294901760, %v2759_v9  ;;  %v2772_v30 = vand.u32 4294901760, %v2771_v5  ;;  %v9176_v32 = vpack.c.bf16 %v2778_v10, %v2771_v5 }
 0x29b   :  { %v2780_v2 = vsub.f32 %v2778_v10, %v2779_v21 }
 0x29c   :  { %v7931_v47 = vpack.c.bf16 %v2767_v20, %v2760_v14  ;;  %v2773_v60 = vsub.f32 %v2771_v5, %v2772_v30  ;;  %v9180_v61 = vpack.c.bf16 %v2779_v21, %v2772_v30 }
 0x29d   :  { %v2781_v4 = vand.u32 4294901760, %v2780_v2 }
 0x29e   :  { %v2774_v16 = vand.u32 4294901760, %v2773_v60 }
 0x29f   :  { %7918 = vmatpush3.bf16.xpose.msra.mxu1 %v9158_v37 }
 0x2a0   :  { %7920 = vmatprep.subr.bf16.mxu1 %v9178_v42  ;;  %v7935_v23 = vpack.c.bf16 %v2781_v4, %v2774_v16 }
 0x2a7   :  { %7922 = vmatpush3.bf16.xpose.msra.mxu1 %v9178_v42 }
 0x2a8   :  { %7924 = vmatprep.subr.bf16.mxu1 %v7923_v34 }
 0x341   :  { %v7195_v35 = vpop.f32.mrb[10].mxu0 }
 0x342   :  { %v2571_v36 = vmul.f32 %v7195_v35, %v9188_v8  ;;  %v2544_v45 = vpop.f32.mrb[11].mxu0 }
 0x343   :  { %v2570_v48 = vmul.f32 %v9193_v58, %v2544_v45 }
 0x344   :  { %v2582_v63 = vsel %vm606_vm2, %v2571_v36, 0 }
 0x345   :  { %v9208_v25 = vand.u32 4294901760, %v2582_v63  ;;  %v2579_v13 = vsel %vm606_vm2, %v2570_v48, 0  ;;  %v7198_v11 = vpop.f32.mrb[12].mxu0 }
 0x346   :  { %v9211_v28 = vand.u32 4294901760, %v2579_v13  ;;  %v2573_v0 = vmul.f32 %v7198_v11, %v9200_v52  ;;  %v2556_v39 = vpop.f32.mrb[13].mxu0 }
 0x347   :  { %v2698_v40 = vsub.f32 %v2582_v63, %v9208_v25  ;;  %v2572_v41 = vmul.f32 %v9206_v49, %v2556_v39 }
 0x348   :  { %v2688_v50 = vsub.f32 %v2579_v13, %v9211_v28  ;;  %v2588_v6 = vsel %vm606_vm2, %v2573_v0, 0 }
 0x349   :  { %v2699_v43 = vand.u32 4294901760, %v2698_v40  ;;  %v9218_v44 = vand.u32 4294901760, %v2588_v6  ;;  %v2585_v54 = vsel %vm606_vm2, %v2572_v41, 0 }
 0x34a   :  { %v9221_v51 = vand.u32 4294901760, %v2585_v54  ;;  %v2689_v10 = vand.u32 4294901760, %v2688_v50 }
 0x34b   :  { %v2700_v57 = vsub.f32 %v2698_v40, %v2699_v43  ;;  %v2718_v5 = vsub.f32 %v2588_v6, %v9218_v44 }
 0x34c   :  { %v2708_v9 = vsub.f32 %v2585_v54, %v9221_v51  ;;  %v2690_v15 = vsub.f32 %v2688_v50, %v2689_v10 }
 0x34d   :  { %v2719_v21 = vand.u32 4294901760, %v2718_v5  ;;  %v2701_v30 = vand.u32 4294901760, %v2700_v57 }
 0x34e   :  { %v2691_v14 = vand.u32 4294901760, %v2690_v15  ;;  %v2709_v20 = vand.u32 4294901760, %v2708_v9 }
 0x34f   :  { %v2720_v1 = vsub.f32 %v2718_v5, %v2719_v21 }
 0x350   :  { %7215 = vmatprep.mubr.f32.mxu1 %v2691_v14  ;;  %v2710_v38 = vsub.f32 %v2708_v9, %v2709_v20 }
 0x351   :  { %7216 = vmatmul.mubr.f32.vlgmr.msra.gmra.mrb[10].mxu1 %v2701_v30  ;;  %v2721_v60 = vand.u32 4294901760, %v2720_v1 }
 0x352   :  { %7926 = vmatpush3.bf16.xpose.msra.mxu1 %v7923_v34  ;;  %v2711_v2 = vand.u32 4294901760, %v2710_v38 }
 0x353   :  { %7928 = vmatprep.subr.bf16.mxu1 %v9172_v17 }
 0x354   :  { %7218 = vmatprep.mubr.f32.mxu1 %v2711_v2 }
 0x355   :  { %7219 = vmatmul.mubr.f32.gmra.mrb[12].mxu1 %v2721_v60 }
 0x356   :  { %7237 = vmatprep.mubr.f32.mxu1 %v9211_v28 }
 0x35a   :  { %7930 = vmatpush3.bf16.xpose.msra.mxu1 %v9172_v17 }
 0x35b   :  { %7932 = vmatprep.subr.bf16.mxu1 %v7931_v47 }
 0x362   :  { %7934 = vmatpush3.bf16.xpose.msra.mxu1 %v7931_v47  ;;  %v2576_v47 = vld [vmem:[%s9826_s3 + $0x10] sm:$0xff] }
 0x363   :  { %7936 = vmatprep.subr.bf16.mxu1 %v7935_v23 }
 0x36a   :  { %7938 = vmatpush3.bf16.xpose.msra.mxu1 %v7935_v23 }
 0x36b   :  { %7940 = vmatprep.subr.bf16.mxu1 %v9137_v22 }
 0x371   :  { %7238 = vmatmul.mubr.f32.vlgmr.msra.gmra.mrb[10].mxu1 %v9208_v25 }
 0x372   :  { %7240 = vmatprep.mubr.f32.mxu1 %v9221_v51  ;;  %7942 = vmatpush3.bf16.xpose.msra.mxu1 %v9137_v22  ;;  %v2574_v22 = vld [vmem:[%s9826_s3] sm:$0xff] }
 0x373   :  { %7944 = vmatprep.subr.bf16.mxu1 %v9156_v33 }
 0x375   :  { %7241 = vmatmul.mubr.f32.gmra.mrb[12].mxu1 %v9218_v44 }
 0x376   :  { %7259 = vmatprep.mubr.f32.mxu1 %v2688_v50 }
 0x37a   :  { %7946 = vmatpush3.bf16.xpose.msra.mxu1 %v9156_v33 }
 0x37b   :  { %7948 = vmatprep.subr.bf16.mxu1 %v9164_v55 }
 0x382   :  { %7950 = vmatpush3.bf16.xpose.msra.mxu1 %v9164_v55 }
 0x383   :  { %7952 = vmatprep.subr.bf16.mxu1 %v9176_v32 }
 0x38a   :  { %7954 = vmatpush3.bf16.xpose.msra.mxu1 %v9176_v32  ;;  %v2577_v32 = vld [vmem:[%s9826_s3 + $0x18] sm:$0xff] }
 0x38b   :  { %7956 = vmatprep.subr.bf16.mxu1 %v9127_v56 }
 0x391   :  { %7260 = vmatmul.mubr.f32.vlgmr.msra.gmra.mrb[10].mxu1 %v2698_v40 }
 0x392   :  { %7262 = vmatprep.mubr.f32.mxu1 %v2708_v9  ;;  %7958 = vmatpush3.bf16.xpose.msra.mxu1 %v9127_v56 }
 0x393   :  { %7960 = vmatprep.subr.bf16.mxu1 %v9143_v27 }
 0x395   :  { %7263 = vmatmul.mubr.f32.gmra.mrb[12].mxu1 %v2718_v5 }
 0x396   :  { %7281 = vmatprep.mubr.f32.mxu1 %v2689_v10 }
 0x39a   :  { %7962 = vmatpush3.bf16.xpose.msra.mxu1 %v9143_v27 }
 0x39b   :  { %7964 = vmatprep.subr.bf16.mxu1 %v9158_v37 }
 0x3a2   :  { %7966 = vmatpush3.bf16.xpose.msra.mxu1 %v9158_v37 }
 0x3a3   :  { %7968 = vmatprep.subr.bf16.mxu1 %v9178_v42 }
 0x3aa   :  { %7970 = vmatpush3.bf16.xpose.msra.mxu1 %v9178_v42 }
 0x3ab   :  { %7972 = vmatprep.subr.bf16.mxu1 %v9167_v59 }
 0x3b1   :  { %7282 = vmatmul.mubr.f32.vlgmr.msra.gmra.mrb[10].mxu1 %v2699_v43 }
 0x3b2   :  { %7284 = vmatprep.mubr.f32.mxu1 %v2709_v20  ;;  %7974 = vmatpush3.bf16.xpose.msra.mxu1 %v9167_v59 }
 0x3b3   :  { %7976 = vmatprep.subr.bf16.mxu1 %v9169_v62 }
 0x3b5   :  { %7285 = vmatmul.mubr.f32.gmra.mrb[12].mxu1 %v2719_v21 }
 0x3b6   :  { %7303 = vmatprep.mubr.f32.mxu1 %v9211_v28 }
 0x3ba   :  { %7978 = vmatpush3.bf16.xpose.msra.mxu1 %v9169_v62 }
 0x3bb   :  { %7980 = vmatprep.subr.bf16.mxu1 %v9174_v26 }
 0x3c2   :  { %7982 = vmatpush3.bf16.xpose.msra.mxu1 %v9174_v26 }
 0x3c3   :  { %7984 = vmatprep.subr.bf16.mxu1 %v9180_v61 }
 0x3ca   :  { %7986 = vmatpush3.bf16.xpose.msra.mxu1 %v9180_v61 }
 0x3cb   :  { %7988 = vmatprep.subr.bf16.mxu1 %v9127_v56 }
 0x3d1   :  { %7304 = vmatmul.mubr.f32.vlgmr.msra.gmra.mrb[10].mxu1 %v9208_v25 }
 0x3d2   :  { %7306 = vmatprep.mubr.f32.mxu1 %v9221_v51  ;;  %7990 = vmatpush3.bf16.xpose.msra.mxu1 %v9127_v56  ;;  %v2575_v56 = vld [vmem:[%s9826_s3 + $0x8] sm:$0xff] }
 0x3d3   :  { %7992 = vmatprep.subr.bf16.mxu1 %v9143_v27 }
 0x3d5   :  { %7307 = vmatmul.mubr.f32.gmra.mrb[12].mxu1 %v9218_v44 }
 0x3d6   :  { %7325 = vmatprep.mubr.f32.mxu1 %v9211_v28 }
 0x3da   :  { %7994 = vmatpush3.bf16.xpose.msra.mxu1 %v9143_v27 }
 0x3db   :  { %7996 = vmatprep.subr.bf16.mxu1 %v9158_v37 }
 0x3e2   :  { %7998 = vmatpush3.bf16.xpose.msra.mxu1 %v9158_v37 }
 0x3e3   :  { %8000 = vmatprep.subr.bf16.mxu1 %v9178_v42 }
 0x3ea   :  { %8002 = vmatpush3.bf16.xpose.msra.mxu1 %v9178_v42 }
 0x3f1   :  { %7326 = vmatmul.mubr.f32.vlgmr.msra.gmra.mrb[10].mxu1 %v9208_v25 }
 0x3f2   :  { %7328 = vmatprep.mubr.f32.mxu1 %v9221_v51 }
 0x3f5   :  { %7329 = vmatmul.mubr.f32.gmra.mrb[12].mxu1 %v9218_v44 }
 0x4c4   :  { %v7327_v27 = vpop.f32.mrb[10].mxu1 }
 0x4c5   :  { %v8207_v33 = vadd.f32 %v7327_v27, %v2575_v56  ;;  %v3258_v37 = vpop.f32.mrb[11].mxu1 }
 0x4c6   :  { %v8208_v55 = vadd.f32 %v3258_v37, %v2574_v22 }
 0x4c7   :  { %v3283_v59 = vsel %vm54_vm1, %v8207_v33, -inf }
 0x4c8   :  { %3284 = vmax.xlane.f32.xlu1 %v3283_v59  ;;  %v7330_v62 = vpop.f32.mrb[12].mxu1  ;;  %v3280_v17 = vsel %vm54_vm1, %v8208_v55, -inf }
 0x4c9   :  { %v3270_v26 = vpop.f32.mrb[13].mxu1  ;;  %3281 = vmax.xlane.f32.xlu0 %v3280_v17  ;;  %v8209_v42 = vadd.f32 %v7330_v62, %v2577_v32 }
 0x4ca   :  { %v8210_v61 = vadd.f32 %v3270_v26, %v2576_v47 }
 0x4cb   :  { %v3289_v4 = vsel %vm54_vm1, %v8209_v42, -inf }
 0x4cc   :  { %v3286_v16 = vsel %vm54_vm1, %v8210_v61, -inf }
 0x4d9   :  { %3324 = vrot.lane.b32.xlu1 %v9115_v31, %s8518_s19 }
 0x4df   :  { %3326 = vrot.lane.b32.xlu0 %v9112_v29, %s8518_s19 }
 0x4e3   :  { %3334 = vrot.lane.b32.xlu0 %v9135_v12, %s8518_s19 }
 0x4e7   :  { %3338 = vrot.lane.b32.xlu0 %v9151_v7, %s8518_s19 }
 0x4fd   :  { %3290 = vmax.xlane.f32.xlu1 %v3289_v4 }
 0x501   :  { %3287 = vmax.xlane.f32.xlu1 %v3286_v16 }
 0x512   :  { %3328 = vrot.lane.b32.xlu1 %v9125_v53, %s8518_s19 }
 0x516   :  { %3330 = vrot.lane.b32.xlu1 %v9122_v46, %s8518_s19 }
 0x51a   :  { %3332 = vrot.lane.b32.xlu1 %v9141_v24, %s8518_s19 }
 0x555   :  { %v3285_v18 = vpop.xlane.xlu1 %3284 }
 0x556   :  { %v3293_v3 = vsub.f32 %v8207_v33, %v3285_v18  ;;  %v3282_v23 = vpop.xlane.xlu0 %3281 }
 0x557   :  { %v3292_v34 = vsub.f32 %v8208_v55, %v3282_v23 }
 0x558   :  { %v3298_v35 = vmul.f32 1.442695, %v3293_v3 }
 0x559   :  { %v3296_v36 = vmul.f32 1.442695, %v3292_v34  ;;  %v3325_v45 = vpop.permute.xlu1 %3324 }
 0x55a   :  { %8442 = vpow2.f32 %v3298_v35  ;;  %v3361_v48 = vand.u32 4294901760, %v3325_v45  ;;  %v3327_v63 = vpop.permute.xlu0 %3326 }
 0x55b   :  { %v3364_v25 = vand.u32 4294901760, %v3327_v63  ;;  %8444 = vpow2.f32 %v3296_v36 }
 0x55c   :  { %v3475_v13 = vsub.f32 %v3325_v45, %v3361_v48 }
 0x55d   :  { %v9301_v11 = vpack.c.bf16 %v3364_v25, %v3361_v48  ;;  %v3482_v28 = vsub.f32 %v3327_v63, %v3364_v25 }
 0x55e   :  { %v3476_v0 = vand.u32 4294901760, %v3475_v13  ;;  %v3335_v39 = vpop.permute.xlu0 %3334 }
 0x55f   :  { %v3483_v40 = vand.u32 4294901760, %v3482_v28  ;;  %v3376_v41 = vand.u32 4294901760, %v3335_v39  ;;  %8004 = vmatprep.subr.bf16.mxu0 %v9301_v11  ;;  %v9304_v50 = vpack.c.bf16 %v3482_v28, %v3475_v13 }
 0x560   :  { %v3477_v6 = vsub.f32 %v3475_v13, %v3476_v0  ;;  %8006 = vmatpush3.bf16.msra.mxu0 %v9301_v11 }
 0x561   :  { %v3484_v43 = vsub.f32 %v3482_v28, %v3483_v40  ;;  %v3510_v44 = vsub.f32 %v3335_v39, %v3376_v41  ;;  %v9307_v54 = vpack.c.bf16 %v3483_v40, %v3476_v0 }
 0x562   :  { %v3478_v51 = vand.u32 4294901760, %v3477_v6  ;;  %v6337_v6 = vld [vmem:[%s9833_s10] ss:$0 sm:$0xff] }
 0x563   :  { %v3485_v10 = vand.u32 4294901760, %v3484_v43  ;;  %v3511_v17 = vand.u32 4294901760, %v3510_v44 }
 0x564   :  { %v9309_v57 = vpop.eup %8442 }
 0x565   :  { %v3307_v5 = vsel %vm54_vm1, %v9309_v57, 0.0  ;;  %v9313_v9 = vpack.c.bf16 %v3485_v10, %v3478_v51  ;;  %v8445_v15 = vpop.eup %8444  ;;  %v3512_v35 = vsub.f32 %v3510_v44, %v3511_v17 }
 0x566   :  { %3308 = vadd.xlane.f32.xlu1 %v3307_v5  ;;  %v3304_v21 = vsel %vm54_vm1, %v8445_v15, 0.0 }
 0x567   :  { %v3513_v40 = vand.u32 4294901760, %v3512_v35 }
 0x56a   :  { %3305 = vadd.xlane.f32.xlu1 %v3304_v21 }
 0x58a   :  { %v3291_v14 = vpop.xlane.xlu1 %3290 }
 0x58b   :  { %v3295_v20 = vsub.f32 %v8209_v42, %v3291_v14 }
 0x58d   :  { %v3302_v30 = vmul.f32 1.442695, %v3295_v20 }
 0x58e   :  { %v3288_v1 = vpop.xlane.xlu1 %3287 }
 0x58f   :  { %8446 = vpow2.f32 %v3302_v30  ;;  %v3294_v38 = vsub.f32 %v8210_v61, %v3288_v1 }
 0x591   :  { %v3300_v2 = vmul.f32 1.442695, %v3294_v38 }
 0x592   :  { %v3329_v60 = vpop.permute.xlu1 %3328 }
 0x593   :  { %8448 = vpow2.f32 %v3300_v2  ;;  %v3367_v56 = vand.u32 4294901760, %v3329_v60 }
 0x595   :  { %v3489_v22 = vsub.f32 %v3329_v60, %v3367_v56 }
 0x596   :  { %v3331_v27 = vpop.permute.xlu1 %3330 }
 0x597   :  { %v3490_v33 = vand.u32 4294901760, %v3489_v22  ;;  %v3370_v37 = vand.u32 4294901760, %v3331_v27 }
 0x599   :  { %v9316_v55 = vpop.eup %8446  ;;  %v9318_v59 = vpack.c.bf16 %v3370_v37, %v3367_v56  ;;  %v3496_v62 = vsub.f32 %v3331_v27, %v3370_v37  ;;  %v3491_v42 = vsub.f32 %v3489_v22, %v3490_v33  ;;  %v3339_v27 = vpop.permute.xlu0 %3338 }
 0x59a   :  { %v3333_v26 = vpop.permute.xlu1 %3332  ;;  %v3313_v32 = vsel %vm54_vm1, %v9316_v55, 0.0  ;;  %v3382_v37 = vand.u32 4294901760, %v3339_v27 }
 0x59b   :  { %v3497_v47 = vand.u32 4294901760, %v3496_v62  ;;  %v3373_v61 = vand.u32 4294901760, %v3333_v26  ;;  %3314 = vadd.xlane.f32.xlu1 %v3313_v32  ;;  %8008 = vmatprep.subr.bf16.mxu0 %v9318_v59  ;;  %v9323_v4 = vpack.c.bf16 %v3496_v62, %v3489_v22  ;;  %v3492_v48 = vand.u32 4294901760, %v3491_v42 }
 0x59c   :  { %8010 = vmatpush3.bf16.msra.mxu0 %v9318_v59  ;;  %v9368_v42 = vsub.f32 %v3339_v27, %v3382_v37 }
 0x59d   :  { %v9326_v16 = vpop.eup %8448  ;;  %v3498_v18 = vsub.f32 %v3496_v62, %v3497_v47  ;;  %v9328_v3 = vpack.c.bf16 %v3376_v41, %v3373_v61  ;;  %v3503_v23 = vsub.f32 %v3333_v26, %v3373_v61  ;;  %v9330_v34 = vpack.c.bf16 %v3497_v47, %v3490_v33 }
 0x59e   :  { %v3310_v36 = vsel %vm54_vm1, %v9326_v16, 0.0 }
 0x59f   :  { %v3504_v45 = vand.u32 4294901760, %v3503_v23  ;;  %3311 = vadd.xlane.f32.xlu1 %v3310_v36  ;;  %8012 = vmatprep.subr.bf16.mxu0 %v9328_v3  ;;  %v3499_v63 = vand.u32 4294901760, %v3498_v18  ;;  %v9335_v25 = vpack.c.bf16 %v3510_v44, %v3503_v23 }
 0x5a0   :  { %8014 = vmatpush3.bf16.msra.mxu0 %v9328_v3 }
 0x5a1   :  { %v3505_v13 = vsub.f32 %v3503_v23, %v3504_v45  ;;  %v9338_v28 = vpack.c.bf16 %v3499_v63, %v3492_v48  ;;  %v9340_v0 = vpack.c.bf16 %v3511_v17, %v3504_v45  ;;  %v3525_v45 = vand.u32 4294901760, %v9368_v42 }
 0x5a3   :  { %v3506_v39 = vand.u32 4294901760, %v3505_v13 }
 0x5a5   :  { %v9342_v41 = vpack.c.bf16 %v3513_v40, %v3506_v39 }
 0x5b0   :  { %3336 = vrot.lane.b32.xlu1 %v9154_v19, %s8518_s19 }
 0x5b4   :  { %1915 = vrot.lane.b32.xlu1 %v6337_v6, %s8519_s24  ;;  %v3526_v6 = vsub.f32 %v9368_v42, %v3525_v45 }
 0x5f3   :  { %v3309_v43 = vpop.xlane.xlu1 %3308 }
 0x5f7   :  { %v3306_v44 = vpop.xlane.xlu1 %3305 }
 0x5f8   :  { %8450 = vrcp.f32 %v3306_v44 }
 0x5f9   :  { %8452 = vrcp.f32 %v3309_v43 }
 0x602   :  { %v8451_v51 = vpop.eup %8450 }
 0x603   :  { %v3317_v10 = vmul.f32 %v8451_v51, %v8445_v15  ;;  %v8453_v38 = vpop.eup %8452 }
 0x604   :  { %v3319_v2 = vmul.f32 %v8453_v38, %v9309_v57 }
 0x605   :  { %v3349_v5 = vsel %vm54_vm1, %v3317_v10, 0  ;;  %v3527_v10 = vand.u32 4294901760, %v3526_v6 }
 0x606   :  { %v9351_v21 = vand.u32 4294901760, %v3349_v5  ;;  %v3352_v15 = vsel %vm54_vm1, %v3319_v2, 0 }
 0x607   :  { %v9362_v60 = vand.u32 4294901760, %v3352_v15 }
 0x608   :  { %v9354_v14 = vsub.f32 %v3349_v5, %v9351_v21 }
 0x609   :  { %v9365_v22 = vsub.f32 %v3352_v15, %v9362_v60 }
 0x60a   :  { %v3435_v20 = vand.u32 4294901760, %v9354_v14 }
 0x60b   :  { %v3445_v62 = vand.u32 4294901760, %v9365_v22 }
 0x60c   :  { %v3436_v30 = vsub.f32 %v9354_v14, %v3435_v20 }
 0x60d   :  { %v3446_v61 = vsub.f32 %v9365_v22, %v3445_v62 }
 0x60e   :  { %v3437_v1 = vand.u32 4294901760, %v3436_v30 }
 0x60f   :  { %v3447_v48 = vand.u32 4294901760, %v3446_v61 }
 0x610   :  { %7347 = vmatprep.mubr.f32.mxu0 %v3437_v1 }
 0x628   :  { %v3315_v56 = vpop.xlane.xlu1 %3314 }
 0x629   :  { %8454 = vrcp.f32 %v3315_v56 }
 0x62c   :  { %v3312_v33 = vpop.xlane.xlu1 %3311 }
 0x62d   :  { %8456 = vrcp.f32 %v3312_v33 }
 0x630   :  { %v3337_v17 = vpop.permute.xlu1 %3336 }
 0x631   :  { %v3379_v26 = vand.u32 4294901760, %v3337_v17 }
 0x633   :  { %v8455_v32 = vpop.eup %8454  ;;  %v9370_v57 = vpack.c.bf16 %v3382_v37, %v3379_v26  ;;  %v9372_v47 = vsub.f32 %v3337_v17, %v3379_v26 }
 0x634   :  { %v3323_v18 = vmul.f32 %v8455_v32, %v9316_v55 }
 0x635   :  { %v3518_v23 = vand.u32 4294901760, %v9372_v47  ;;  %8016 = vmatprep.subr.bf16.mxu0 %v9370_v57 }
 0x636   :  { %8018 = vmatpush3.bf16.msra.mxu0 %v9370_v57  ;;  %v3358_v35 = vsel %vm54_vm1, %v3323_v18, 0 }
 0x637   :  { %v8457_v36 = vpop.eup %8456  ;;  %8020 = vmatprep.subr.bf16.mxu0 %v9313_v9  ;;  %v9384_v63 = vand.u32 4294901760, %v3358_v35  ;;  %v3519_v55 = vsub.f32 %v9372_v47, %v3518_v23 }
 0x638   :  { %v3321_v13 = vmul.f32 %v8457_v36, %v9326_v16 }
 0x639   :  { %7348 = vmatmul.mubr.f32.vlgmr.msra.gmra.mrb[14].mxu0 %v3447_v48  ;;  %v3464_v39 = vsub.f32 %v3358_v35, %v9384_v63  ;;  %v3520_v44 = vand.u32 4294901760, %v3519_v55 }
 0x63a   :  { %8022 = vmatpush3.bf16.msra.mxu0 %v9313_v9  ;;  %v3355_v40 = vsel %vm54_vm1, %v3321_v13, 0  ;;  %v4618_v13 = vld [vmem:[%s9830_s7] sm:$0xff] }
 0x63b   :  { %8024 = vmatprep.subr.bf16.mxu0 %v9338_v28  ;;  %v9397_v43 = vand.u32 4294901760, %v3355_v40  ;;  %v3465_v16 = vand.u32 4294901760, %v3464_v39  ;;  %v8031_v30 = vpack.c.bf16 %v3527_v10, %v3520_v44  ;;  %v4627_v55 = vsel %vm606_vm2, %v4618_v13, 0  ;;  %v4619_v44 = vld [vmem:[%s9830_s7 + $0x8] sm:$0xff] }
 0x63d   :  { %v3454_v51 = vsub.f32 %v3355_v40, %v9397_v43  ;;  %v3466_v5 = vsub.f32 %v3464_v39, %v3465_v16 }
 0x63e   :  { %8026 = vmatpush3.bf16.msra.mxu0 %v9338_v28  ;;  %v8047_v28 = vpack.c.bf16 %v9368_v42, %v9372_v47 }
 0x63f   :  { %8028 = vmatprep.subr.bf16.mxu0 %v9342_v41  ;;  %v3455_v9 = vand.u32 4294901760, %v3454_v51  ;;  %v3467_v2 = vand.u32 4294901760, %v3466_v5 }
 0x641   :  { %v3456_v1 = vsub.f32 %v3454_v51, %v3455_v9 }
 0x642   :  { %8030 = vmatpush3.bf16.msra.mxu0 %v9342_v41 }
 0x643   :  { %8032 = vmatprep.subr.bf16.mxu0 %v8031_v30  ;;  %v3457_v38 = vand.u32 4294901760, %v3456_v1  ;;  %v4621_v1 = vld [vmem:[%s9830_s7 + $0x18] sm:$0xff] }
 0x645   :  { %7350 = vmatprep.mubr.f32.mxu0 %v3457_v38  ;;  %v4622_v38 = vld [vmem:[%s9830_s7 + $0x20] sm:$0xff] }
 0x646   :  { %7351 = vmatmul.mubr.f32.gmra.mrb[16].mxu0 %v3467_v2 }
 0x647   :  { %8034 = vmatpush3.bf16.msra.mxu0 %v8031_v30  ;;  %7369 = vmatprep.mubr.f32.mxu0 %v9351_v21 }
 0x648   :  { %8036 = vmatprep.subr.bf16.mxu0 %v9304_v50 }
 0x64a   :  { %7370 = vmatmul.mubr.f32.vlgmr.msra.gmra.mrb[14].mxu0 %v9362_v60 }
 0x64b   :  { %8038 = vmatpush3.bf16.msra.mxu0 %v9304_v50  ;;  %7372 = vmatprep.mubr.f32.mxu0 %v9397_v43  ;;  %v8079_v50 = vpack.c.bf16 %v3525_v45, %v3518_v23 }
 0x64c   :  { %8040 = vmatprep.subr.bf16.mxu0 %v9323_v4 }
 0x64e   :  { %7373 = vmatmul.mubr.f32.gmra.mrb[16].mxu0 %v9384_v63 }
 0x64f   :  { %8042 = vmatpush3.bf16.msra.mxu0 %v9323_v4  ;;  %7391 = vmatprep.mubr.f32.mxu0 %v9354_v14 }
 0x650   :  { %8044 = vmatprep.subr.bf16.mxu0 %v9335_v25 }
 0x653   :  { %8046 = vmatpush3.bf16.msra.mxu0 %v9335_v25 }
 0x654   :  { %8048 = vmatprep.subr.bf16.mxu0 %v8047_v28 }
 0x657   :  { %8050 = vmatpush3.bf16.msra.mxu0 %v8047_v28  ;;  %v4636_v28 = vsel %vm606_vm2, %v4621_v1, 0 }
 0x658   :  { %8052 = vmatprep.subr.bf16.mxu0 %v9301_v11 }
 0x65a   :  { %7392 = vmatmul.mubr.f32.vlgmr.msra.gmra.mrb[14].mxu0 %v9365_v22 }
 0x65b   :  { %7394 = vmatprep.mubr.f32.mxu0 %v3454_v51  ;;  %8054 = vmatpush3.bf16.msra.mxu0 %v9301_v11  ;;  %v4630_v51 = vsel %vm606_vm2, %v4619_v44, 0 }
 0x65c   :  { %8056 = vmatprep.subr.bf16.mxu0 %v9318_v59  ;;  %v9479_v10 = vand.u32 4294901760, %v4630_v51 }
 0x65e   :  { %7395 = vmatmul.mubr.f32.gmra.mrb[16].mxu0 %v3464_v39  ;;  %v9466_v39 = vand.u32 4294901760, %v4627_v55  ;;  %v9485_v5 = vsub.f32 %v4630_v51, %v9479_v10 }
 0x65f   :  { %8058 = vmatpush3.bf16.msra.mxu0 %v9318_v59  ;;  %7413 = vmatprep.mubr.f32.mxu0 %v3435_v20 }
 0x660   :  { %8060 = vmatprep.subr.bf16.mxu0 %v9328_v3  ;;  %v9469_v40 = vsub.f32 %v4627_v55, %v9466_v39 }
 0x662   :  { %v4721_v6 = vand.u32 4294901760, %v9469_v40 }
 0x663   :  { %8062 = vmatpush3.bf16.msra.mxu0 %v9328_v3 }
 0x664   :  { %8064 = vmatprep.subr.bf16.mxu0 %v9370_v57 }
 0x667   :  { %8066 = vmatpush3.bf16.msra.mxu0 %v9370_v57 }
 0x668   :  { %8068 = vmatprep.subr.bf16.mxu0 %v9307_v54 }
 0x66a   :  { %7414 = vmatmul.mubr.f32.vlgmr.msra.gmra.mrb[14].mxu0 %v3445_v62 }
 0x66b   :  { %7416 = vmatprep.mubr.f32.mxu0 %v3455_v9  ;;  %8070 = vmatpush3.bf16.msra.mxu0 %v9307_v54  ;;  %v4620_v9 = vld [vmem:[%s9830_s7 + $0x10] sm:$0xff] }
 0x66c   :  { %8072 = vmatprep.subr.bf16.mxu0 %v9330_v34  ;;  %v4633_v30 = vsel %vm606_vm2, %v4620_v9, 0 }
 0x66d   :  { %v9494_v2 = vand.u32 4294901760, %v4633_v30 }
 0x66e   :  { %7417 = vmatmul.mubr.f32.gmra.mrb[16].mxu0 %v3465_v16 }
 0x66f   :  { %8074 = vmatpush3.bf16.msra.mxu0 %v9330_v34  ;;  %7435 = vmatprep.mubr.f32.mxu0 %v9351_v21 }
 0x670   :  { %8076 = vmatprep.subr.bf16.mxu0 %v9340_v0 }
 0x673   :  { %8078 = vmatpush3.bf16.msra.mxu0 %v9340_v0 }
 0x674   :  { %8080 = vmatprep.subr.bf16.mxu0 %v8079_v50 }
 0x677   :  { %8082 = vmatpush3.bf16.msra.mxu0 %v8079_v50  ;;  %v4731_v50 = vand.u32 4294901760, %v9485_v5 }
 0x678   :  { %8084 = vmatprep.subr.bf16.mxu0 %v9301_v11 }
 0x67a   :  { %7436 = vmatmul.mubr.f32.vlgmr.msra.gmra.mrb[14].mxu0 %v9362_v60 }
 0x67b   :  { %7438 = vmatprep.mubr.f32.mxu0 %v9397_v43  ;;  %8086 = vmatpush3.bf16.msra.mxu0 %v9301_v11  ;;  %v4026_v11 = vld [vmem:[%s9829_s6] sm:$0xff] }
 0x67c   :  { %8088 = vmatprep.subr.bf16.mxu0 %v9318_v59  ;;  %v4040_v54 = vand.u32 4294901760, %v4026_v11 }
 0x67e   :  { %7439 = vmatmul.mubr.f32.gmra.mrb[16].mxu0 %v9384_v63 }
 0x67f   :  { %8090 = vmatpush3.bf16.msra.mxu0 %v9318_v59  ;;  %7457 = vmatprep.mubr.f32.mxu0 %v9351_v21  ;;  %v4147_v59 = vsub.f32 %v4026_v11, %v4040_v54  ;;  %v4639_v11 = vsel %vm606_vm2, %v4622_v38, 0 }
 0x680   :  { %8092 = vmatprep.subr.bf16.mxu0 %v9328_v3 }
 0x681   :  { %v4148_v4 = vand.u32 4294901760, %v4147_v59 }
 0x683   :  { %8094 = vmatpush3.bf16.msra.mxu0 %v9328_v3  ;;  %v4149_v3 = vsub.f32 %v4147_v59, %v4148_v4 }
 0x684   :  { %8096 = vmatprep.subr.bf16.mxu0 %v9370_v57 }
 0x685   :  { %v4150_v34 = vand.u32 4294901760, %v4149_v3  ;;  %v4624_v3 = vld [vmem:[%s9830_s7 + $0x30] sm:$0xff] }
 0x687   :  { %8098 = vmatpush3.bf16.msra.mxu0 %v9370_v57 }
 0x688   :  { %7463 = vmatprep.subr.mxu0 %v4040_v54 }
 0x68a   :  { %7458 = vmatmul.mubr.f32.vlgmr.msra.gmra.mrb[14].mxu0 %v9362_v60 }
 0x68b   :  { %7460 = vmatprep.mubr.f32.mxu0 %v9397_v43  ;;  %7464 = vmatpush3.msra.mxu0 %v4040_v54  ;;  %v4722_v43 = vsub.f32 %v9469_v40, %v4721_v6 }
 0x68c   :  { %7471 = vmatprep.subr.mxu0 %v4150_v34 }
 0x68d   :  { %v4723_v16 = vand.u32 4294901760, %v4722_v43 }
 0x68e   :  { %7461 = vmatmul.mubr.f32.gmra.mrb[16].mxu0 %v9384_v63 }
 0x75d   :  { %v7459_v25 = vpop.f32.mrb[14].mxu0 }
 0x75e   :  { %v4031_v0 = vsel %vm1978_vm3, %v7459_v25, 0  ;;  %v4004_v41 = vpop.f32.mrb[15].mxu0  ;;  %v4732_v25 = vsub.f32 %v9485_v5, %v4731_v50 }
 0x75f   :  { %v4115_v21 = vand.u32 4294901760, %v4031_v0  ;;  %v4028_v14 = vsel %vm1978_vm3, %v4004_v41, 0 }
 0x760   :  { %v4105_v20 = vand.u32 4294901760, %v4028_v14 }
 0x761   :  { %v4116_v15 = vsub.f32 %v4031_v0, %v4115_v21  ;;  %v7462_v60 = vpop.f32.mrb[16].mxu0  ;;  %v9513_v0 = vand.u32 4294901760, %v4639_v11 }
 0x762   :  { %v4106_v56 = vsub.f32 %v4028_v14, %v4105_v20  ;;  %v4037_v22 = vsel %vm1978_vm3, %v7462_v60, 0  ;;  %v4016_v27 = vpop.f32.mrb[17].mxu0  ;;  %v4645_v60 = vsel %vm606_vm2, %v4624_v3, 0 }
 0x763   :  { %v4117_v33 = vand.u32 4294901760, %v4116_v15  ;;  %v4135_v37 = vand.u32 4294901760, %v4037_v22  ;;  %v4034_v62 = vsel %vm1978_vm3, %v4016_v27, 0 }
 0x764   :  { %v4107_v17 = vand.u32 4294901760, %v4106_v56  ;;  %v4125_v26 = vand.u32 4294901760, %v4034_v62 }
 0x765   :  { %v4118_v32 = vsub.f32 %v4116_v15, %v4117_v33  ;;  %v4136_v42 = vsub.f32 %v4037_v22, %v4135_v37 }
 0x766   :  { %v4126_v57 = vsub.f32 %v4034_v62, %v4125_v26  ;;  %v4108_v47 = vsub.f32 %v4106_v56, %v4107_v17 }
 0x767   :  { %v4137_v61 = vand.u32 4294901760, %v4136_v42  ;;  %v4119_v35 = vand.u32 4294901760, %v4118_v32 }
 0x768   :  { %v4127_v18 = vand.u32 4294901760, %v4126_v57  ;;  %v4109_v23 = vand.u32 4294901760, %v4108_v47 }
 0x769   :  { %v4138_v36 = vsub.f32 %v4136_v42, %v4137_v61 }
 0x76a   :  { %7465 = vmatprep.mubr.f32.mxu0 %v4109_v23  ;;  %v4128_v45 = vsub.f32 %v4126_v57, %v4127_v18 }
 0x76b   :  { %7466 = vmatmul.mubr.f32.vlgmr.msra.gmra.mrb[18].mxu0 %v4119_v35  ;;  %v4139_v63 = vand.u32 4294901760, %v4138_v36 }
 0x76c   :  { %v4129_v48 = vand.u32 4294901760, %v4128_v45  ;;  %7472 = vmatpush3.msra.mxu0 %v4150_v34 }
 0x76d   :  { %7479 = vmatprep.subr.mxu0 %v4147_v59 }
 0x76e   :  { %7468 = vmatprep.mubr.f32.mxu0 %v4129_v48 }
 0x76f   :  { %7469 = vmatmul.mubr.f32.gmra.mrb[20].mxu0 %v4139_v63 }
 0x770   :  { %7473 = vmatprep.mubr.f32.mxu0 %v4105_v20 }
 0x773   :  { %7474 = vmatmul.mubr.f32.vlgmr.msra.gmra.mrb[18].mxu0 %v4115_v21 }
 0x774   :  { %7476 = vmatprep.mubr.f32.mxu0 %v4125_v26  ;;  %7480 = vmatpush3.msra.mxu0 %v4147_v59  ;;  %v9502_v59 = vand.u32 4294901760, %v4636_v28 }
 0x775   :  { %7487 = vmatprep.subr.mxu0 %v4040_v54 }
 0x777   :  { %7477 = vmatmul.mubr.f32.gmra.mrb[20].mxu0 %v4135_v37 }
 0x778   :  { %7481 = vmatprep.mubr.f32.mxu0 %v4106_v56  ;;  %v4625_v56 = vld [vmem:[%s9830_s7 + $0x38] sm:$0xff] }
 0x77b   :  { %7482 = vmatmul.mubr.f32.vlgmr.msra.gmra.mrb[18].mxu0 %v4116_v15  ;;  %v9519_v15 = vsub.f32 %v4636_v28, %v9502_v59 }
 0x77c   :  { %7484 = vmatprep.mubr.f32.mxu0 %v4126_v57  ;;  %7488 = vmatpush3.msra.mxu0 %v4040_v54  ;;  %v4648_v57 = vsel %vm606_vm2, %v4625_v56, 0 }
 0x77d   :  { %7495 = vmatprep.subr.mxu0 %v4148_v4  ;;  %v4751_v23 = vand.u32 4294901760, %v9519_v15  ;;  %v9546_v55 = vand.u32 4294901760, %v4648_v57 }
 0x77f   :  { %7485 = vmatmul.mubr.f32.gmra.mrb[20].mxu0 %v4136_v42  ;;  %v9532_v42 = vand.u32 4294901760, %v4645_v60 }
 0x780   :  { %7489 = vmatprep.mubr.f32.mxu0 %v4107_v17  ;;  %v9529_v17 = vsub.f32 %v4639_v11, %v9513_v0  ;;  %v4752_v11 = vsub.f32 %v9519_v15, %v4751_v23 }
 0x781   :  { %v9551_v44 = vsub.f32 %v4645_v60, %v9532_v42 }
 0x783   :  { %7490 = vmatmul.mubr.f32.vlgmr.msra.gmra.mrb[18].mxu0 %v4117_v33  ;;  %v4781_v60 = vand.u32 4294901760, %v9551_v44 }
 0x784   :  { %7492 = vmatprep.mubr.f32.mxu0 %v4127_v18  ;;  %7496 = vmatpush3.msra.mxu0 %v4148_v4  ;;  %v9505_v4 = vsub.f32 %v4633_v30, %v9494_v2 }
 0x785   :  { %7503 = vmatprep.subr.mxu0 %v4040_v54 }
 0x786   :  { %v4741_v27 = vand.u32 4294901760, %v9505_v4 }
 0x787   :  { %7493 = vmatmul.mubr.f32.gmra.mrb[20].mxu0 %v4137_v61 }
 0x788   :  { %7497 = vmatprep.mubr.f32.mxu0 %v4105_v20  ;;  %v4742_v45 = vsub.f32 %v9505_v4, %v4741_v27 }
 0x78b   :  { %7498 = vmatmul.mubr.f32.vlgmr.msra.gmra.mrb[18].mxu0 %v4115_v21 }
 0x78c   :  { %7500 = vmatprep.mubr.f32.mxu0 %v4125_v26  ;;  %7504 = vmatpush3.msra.mxu0 %v4040_v54  ;;  %v4623_v54 = vld [vmem:[%s9830_s7 + $0x28] sm:$0xff] }
 0x78d   :  { %v4642_v41 = vsel %vm606_vm2, %v4623_v54, 0 }
 0x78e   :  { %v9526_v33 = vand.u32 4294901760, %v4642_v41 }
 0x78f   :  { %7501 = vmatmul.mubr.f32.gmra.mrb[20].mxu0 %v4135_v37 }
 0x790   :  { %7505 = vmatprep.mubr.f32.mxu0 %v4105_v20 }
 0x793   :  { %7506 = vmatmul.mubr.f32.vlgmr.msra.gmra.mrb[18].mxu0 %v4115_v21 }
 0x794   :  { %7508 = vmatprep.mubr.f32.mxu0 %v4125_v26 }
 0x797   :  { %7509 = vmatmul.mubr.f32.gmra.mrb[20].mxu0 %v4135_v37 }
 0x798   :  { %7519 = vmatprep.mubr.f32.mxu0 %v4723_v16  ;;  %v4761_v16 = vand.u32 4294901760, %v9529_v17 }
 0x866   :  { %v7507_v34 = vpop.f32.mrb[18].mxu0 }
 0x867   :  { %v4615_v21 = vmul.f32 %v7507_v34, %v9188_v8  ;;  %v4592_v14 = vpop.f32.mrb[19].mxu0  ;;  %v4733_v8 = vand.u32 4294901760, %v4732_v25  ;;  %v9563_v25 = vsub.f32 %v4648_v57, %v9546_v55 }
 0x868   :  { %v4614_v20 = vmul.f32 %v4592_v14, %v9193_v58 }
 0x869   :  { %v4654_v22 = vand.u32 4294901760, %v4615_v21  ;;  %v4791_v57 = vand.u32 4294901760, %v9563_v25 }
 0x86a   :  { %v4651_v37 = vand.u32 4294901760, %v4614_v20  ;;  %v7510_v62 = vpop.f32.mrb[20].mxu0 }
 0x86b   :  { %v4808_v58 = vsub.f32 %v4615_v21, %v4654_v22  ;;  %v4617_v26 = vmul.f32 %v7510_v62, %v9200_v52  ;;  %v4604_v32 = vpop.f32.mrb[21].mxu0  ;;  %v9543_v52 = vsub.f32 %v4642_v41, %v9526_v33  ;;  %v4743_v21 = vand.u32 4294901760, %v4742_v45 }
 0x86c   :  { %v9535_v47 = vpack.c.bf16 %v4654_v22, %v4651_v37  ;;  %v4801_v61 = vsub.f32 %v4614_v20, %v4651_v37  ;;  %v4616_v18 = vmul.f32 %v4604_v32, %v9206_v49  ;;  %v4762_v20 = vsub.f32 %v9529_v17, %v4761_v16 }
 0x86d   :  { %v4809_v35 = vand.u32 4294901760, %v4808_v58  ;;  %v4660_v36 = vand.u32 4294901760, %v4617_v26  ;;  %v4771_v54 = vand.u32 4294901760, %v9543_v52 }
 0x86e   :  { %v4802_v48 = vand.u32 4294901760, %v4801_v61  ;;  %v4657_v63 = vand.u32 4294901760, %v4616_v18  ;;  %8100 = vmatprep.subr.bf16.mxu0 %v9535_v47  ;;  %v8115_v13 = vpack.c.bf16 %v4808_v58, %v4801_v61 }
 0x86f   :  { %v4822_v43 = vsub.f32 %v4617_v26, %v4660_v36  ;;  %8102 = vmatpush3.bf16.msra.mxu0 %v9535_v47  ;;  %v4810_v49 = vsub.f32 %v4808_v58, %v4809_v35  ;;  %v4753_v58 = vand.u32 4294901760, %v4752_v11  ;;  %v4772_v32 = vsub.f32 %v9543_v52, %v4771_v54  ;;  %v5476_v11 = vld [vmem:[%s9834_s11] sm:$0xff] }
 0x870   :  { %v9553_v51 = vpack.c.bf16 %v4660_v36, %v4657_v63  ;;  %v4815_v9 = vsub.f32 %v4616_v18, %v4657_v63  ;;  %v4803_v30 = vsub.f32 %v4801_v61, %v4802_v48  ;;  %v9555_v1 = vpack.c.bf16 %v4809_v35, %v4802_v48 }
 0x871   :  { %v4823_v38 = vand.u32 4294901760, %v4822_v43  ;;  %v4811_v28 = vand.u32 4294901760, %v4810_v49  ;;  %v4763_v61 = vand.u32 4294901760, %v4762_v20  ;;  %v4782_v18 = vsub.f32 %v9551_v44, %v4781_v60 }
 0x872   :  { %v4816_v3 = vand.u32 4294901760, %v4815_v9  ;;  %8104 = vmatprep.subr.bf16.mxu0 %v9553_v51  ;;  %v4804_v34 = vand.u32 4294901760, %v4803_v30  ;;  %v8119_v41 = vpack.c.bf16 %v4822_v43, %v4815_v9  ;;  %v4773_v36 = vand.u32 4294901760, %v4772_v32 }
 0x873   :  { %8106 = vmatpush3.bf16.msra.mxu0 %v9553_v51  ;;  %v4824_v14 = vsub.f32 %v4822_v43, %v4823_v38  ;;  %v4783_v45 = vand.u32 4294901760, %v4782_v18 }
 0x874   :  { %v8107_v56 = vpack.c.bf16 %v4811_v28, %v4804_v34  ;;  %v4817_v22 = vsub.f32 %v4815_v9, %v4816_v3  ;;  %v8135_v37 = vpack.c.bf16 %v4823_v38, %v4816_v3  ;;  %v5528_v3 = vand.u32 4294901760, %v5476_v11 }
 0x875   :  { %v4825_v62 = vand.u32 4294901760, %v4824_v14 }
 0x876   :  { %7520 = vmatmul.mubr.f32.vlgmr.msra.gmra.mrb[22].mxu0 %v4733_v8  ;;  %8108 = vmatprep.subr.bf16.mxu0 %v8107_v56  ;;  %v4818_v26 = vand.u32 4294901760, %v4817_v22  ;;  %v4792_v8 = vsub.f32 %v9563_v25, %v4791_v57 }
 0x877   :  { %8110 = vmatpush3.bf16.msra.mxu0 %v8107_v56  ;;  %7522 = vmatprep.mubr.f32.mxu0 %v4743_v21  ;;  %v5479_v56 = vld [vmem:[%s9834_s11 + $0x18] sm:$0xff] }
 0x878   :  { %v8111_v35 = vpack.c.bf16 %v4825_v62, %v4818_v26  ;;  %v4793_v48 = vand.u32 4294901760, %v4792_v8  ;;  %v5537_v26 = vand.u32 4294901760, %v5479_v56 }
 0x87a   :  { %7523 = vmatmul.mubr.f32.gmra.mrb[24].mxu0 %v4753_v58  ;;  %8112 = vmatprep.subr.bf16.mxu0 %v8111_v35 }
 0x87b   :  { %8114 = vmatpush3.bf16.msra.mxu0 %v8111_v35  ;;  %7525 = vmatprep.mubr.f32.mxu0 %v4763_v61 }
 0x87c   :  { %8116 = vmatprep.subr.bf16.mxu0 %v8115_v13 }
 0x87e   :  { %7526 = vmatmul.mubr.f32.gmra.mrb[26].mxu0 %v4773_v36 }
 0x87f   :  { %7528 = vmatprep.mubr.f32.mxu0 %v4783_v45 }
 0x882   :  { %7529 = vmatmul.mubr.f32.gmra.mrb[28].mxu0 %v4793_v48  ;;  %v5678_v48 = vsub.f32 %v5476_v11, %v5528_v3 }
 0x883   :  { %7539 = vmatprep.mubr.f32.mxu0 %v9466_v39 }
 0x886   :  { %7540 = vmatmul.mubr.f32.vlgmr.msra.gmra.mrb[22].mxu0 %v9479_v10 }
 0x887   :  { %8118 = vmatpush3.bf16.msra.mxu0 %v8115_v13  ;;  %7542 = vmatprep.mubr.f32.mxu0 %v9494_v2 }
 0x888   :  { %8120 = vmatprep.subr.bf16.mxu0 %v8119_v41 }
 0x88a   :  { %7543 = vmatmul.mubr.f32.gmra.mrb[24].mxu0 %v9502_v59 }
 0x88b   :  { %8122 = vmatpush3.bf16.msra.mxu0 %v8119_v41  ;;  %7545 = vmatprep.mubr.f32.mxu0 %v9513_v0 }
 0x88c   :  { %8124 = vmatprep.subr.bf16.mxu0 %v9535_v47 }
 0x88e   :  { %7546 = vmatmul.mubr.f32.gmra.mrb[26].mxu0 %v9526_v33 }
 0x88f   :  { %7548 = vmatprep.mubr.f32.mxu0 %v9532_v42 }
 0x892   :  { %7549 = vmatmul.mubr.f32.gmra.mrb[28].mxu0 %v9546_v55 }
 0x893   :  { %7559 = vmatprep.mubr.f32.mxu0 %v9469_v40 }
 0x896   :  { %7560 = vmatmul.mubr.f32.vlgmr.msra.gmra.mrb[22].mxu0 %v9485_v5 }
 0x897   :  { %8126 = vmatpush3.bf16.msra.mxu0 %v9535_v47  ;;  %7562 = vmatprep.mubr.f32.mxu0 %v9505_v4  ;;  %v1916_v4 = vpop.permute.xlu1 %1915 }
 0x898   :  { %8128 = vmatprep.subr.bf16.mxu0 %v9553_v51  ;;  %v1922_v63 = vadd.f32 %v9141_v24, %v1916_v4 }
 0x89a   :  { %7563 = vmatmul.mubr.f32.gmra.mrb[24].mxu0 %v9519_v15  ;;  %v1918_v15 = vadd.f32 %v9115_v31, %v1916_v4  ;;  %v6342_v31 = vmul.f32 -1.442695, %v1922_v63 }
 0x89b   :  { %8130 = vmatpush3.bf16.msra.mxu0 %v9553_v51  ;;  %7565 = vmatprep.mubr.f32.mxu0 %v9529_v17 }
 0x89c   :  { %8132 = vmatprep.subr.bf16.mxu0 %v9555_v1  ;;  %v6338_v17 = vmul.f32 -1.442695, %v1918_v15 }
 0x89e   :  { %7566 = vmatmul.mubr.f32.gmra.mrb[26].mxu0 %v9543_v52 }
 0x89f   :  { %7568 = vmatprep.mubr.f32.mxu0 %v9551_v44 }
 0x8a2   :  { %7569 = vmatmul.mubr.f32.gmra.mrb[28].mxu0 %v9563_v25 }
 0x8a3   :  { %7579 = vmatprep.mubr.f32.mxu0 %v4721_v6 }
 0x8a6   :  { %7580 = vmatmul.mubr.f32.vlgmr.msra.gmra.mrb[22].mxu0 %v4731_v50 }
 0x8a7   :  { %8134 = vmatpush3.bf16.msra.mxu0 %v9555_v1  ;;  %7582 = vmatprep.mubr.f32.mxu0 %v4741_v27 }
 0x8a8   :  { %8136 = vmatprep.subr.bf16.mxu0 %v8135_v37 }
 0x8aa   :  { %7583 = vmatmul.mubr.f32.gmra.mrb[24].mxu0 %v4751_v23  ;;  %v1923_v23 = vadd.f32 %v9135_v12, %v1916_v4 }
 0x8ab   :  { %8138 = vmatpush3.bf16.msra.mxu0 %v8135_v37  ;;  %7585 = vmatprep.mubr.f32.mxu0 %v4761_v16 }
 0x8ac   :  { %8140 = vmatprep.subr.bf16.mxu0 %v9535_v47  ;;  %v6343_v13 = vmul.f32 -1.442695, %v1923_v23 }
 0x8ae   :  { %7586 = vmatmul.mubr.f32.gmra.mrb[26].mxu0 %v4771_v54  ;;  %v5477_v54 = vld [vmem:[%s9834_s11 + $0x8] sm:$0xff] }
 0x8af   :  { %7588 = vmatprep.mubr.f32.mxu0 %v4781_v60  ;;  %v5531_v34 = vand.u32 4294901760, %v5477_v54  ;;  %v5478_v60 = vld [vmem:[%s9834_s11 + $0x10] sm:$0xff] }
 0x8b0   :  { %v5534_v58 = vand.u32 4294901760, %v5478_v60 }
 0x8b1   :  { %v9652_v21 = vpack.c.bf16 %v5531_v34, %v5528_v3 }
 0x8b2   :  { %7589 = vmatmul.mubr.f32.gmra.mrb[28].mxu0 %v4791_v57  ;;  %v9663_v57 = vpack.c.bf16 %v5537_v26, %v5534_v58 }
 0x8b3   :  { %7599 = vmatprep.mubr.f32.mxu0 %v9466_v39  ;;  %8148 = vmatprep.subr.bf16.mxu1 %v9652_v21 }
 0x8b4   :  { %8150 = vmatpush3.bf16.msra.mxu1 %v9652_v21 }
 0x8b5   :  { %8152 = vmatprep.subr.bf16.mxu1 %v9663_v57 }
 0x8b6   :  { %7600 = vmatmul.mubr.f32.vlgmr.msra.gmra.mrb[22].mxu0 %v9479_v10 }
 0x8b7   :  { %8142 = vmatpush3.bf16.msra.mxu0 %v9535_v47  ;;  %7602 = vmatprep.mubr.f32.mxu0 %v9494_v2 }
 0x8b8   :  { %8144 = vmatprep.subr.bf16.mxu0 %v9553_v51  ;;  %8154 = vmatpush3.bf16.msra.mxu1 %v9663_v57 }
 0x8ba   :  { %7603 = vmatmul.mubr.f32.gmra.mrb[24].mxu0 %v9502_v59 }
 0x8bb   :  { %8146 = vmatpush3.bf16.msra.mxu0 %v9553_v51  ;;  %7605 = vmatprep.mubr.f32.mxu0 %v9513_v0 }
 0x8be   :  { %7606 = vmatmul.mubr.f32.gmra.mrb[26].mxu0 %v9526_v33 }
 0x8bf   :  { %7608 = vmatprep.mubr.f32.mxu0 %v9532_v42 }
 0x8c2   :  { %7609 = vmatmul.mubr.f32.gmra.mrb[28].mxu0 %v9546_v55 }
 0x8c3   :  { %7619 = vmatprep.mubr.f32.mxu0 %v9466_v39 }
 0x8c6   :  { %7620 = vmatmul.mubr.f32.vlgmr.msra.gmra.mrb[22].mxu0 %v9479_v10 }
 0x8c7   :  { %7622 = vmatprep.mubr.f32.mxu0 %v9494_v2 }
 0x8ca   :  { %7623 = vmatmul.mubr.f32.gmra.mrb[24].mxu0 %v9502_v59 }
 0x8cb   :  { %7625 = vmatprep.mubr.f32.mxu0 %v9513_v0  ;;  %v1919_v0 = vadd.f32 %v9112_v29, %v1916_v4  ;;  %v1925_v29 = vadd.f32 %v9151_v7, %v1916_v4 }
 0x8cd   :  { %v6339_v27 = vmul.f32 -1.442695, %v1919_v0 }
 0x8ce   :  { %7626 = vmatmul.mubr.f32.gmra.mrb[26].mxu0 %v9526_v33  ;;  %v1921_v33 = vadd.f32 %v9122_v46, %v1916_v4  ;;  %v6345_v46 = vmul.f32 -1.442695, %v1925_v29 }
 0x8cf   :  { %7628 = vmatprep.mubr.f32.mxu0 %v9532_v42  ;;  %v1920_v42 = vadd.f32 %v9125_v53, %v1916_v4  ;;  %8458 = vpow2.f32 %v6339_v27  ;;  %v5692_v27 = vsub.f32 %v5478_v60, %v5534_v58 }
 0x8d0   :  { %v6341_v47 = vmul.f32 -1.442695, %v1921_v33  ;;  %8460 = vpow2.f32 %v6338_v17  ;;  %v5699_v33 = vsub.f32 %v5479_v56, %v5537_v26 }
 0x8d1   :  { %v6340_v52 = vmul.f32 -1.442695, %v1920_v42  ;;  %v5693_v29 = vand.u32 4294901760, %v5692_v27 }
 0x8d2   :  { %7629 = vmatmul.mubr.f32.gmra.mrb[28].mxu0 %v9546_v55  ;;  %8462 = vpow2.f32 %v6341_v47  ;;  %v1924_v55 = vadd.f32 %v9154_v19, %v1916_v4 }
 0x8d3   :  { %8464 = vpow2.f32 %v6340_v52 }
 0x8d4   :  { %8466 = vpow2.f32 %v6343_v13  ;;  %v6344_v53 = vmul.f32 -1.442695, %v1924_v55  ;;  %v5700_v55 = vand.u32 4294901760, %v5699_v33 }
 0x8d5   :  { %8468 = vpow2.f32 %v6342_v31 }
 0x8d6   :  { %8470 = vpow2.f32 %v6345_v46 }
 0x8d7   :  { %8472 = vpow2.f32 %v6344_v53  ;;  %v5694_v53 = vsub.f32 %v5692_v27, %v5693_v29 }
 0x8d9   :  { %v8459_v43 = vpop.eup %8458 }
 0x8da   :  { %v8461_v49 = vpop.eup %8460  ;;  %v1951_v12 = vadd.f32 1.0, %v8459_v43  ;;  %v5701_v43 = vsub.f32 %v5699_v33, %v5700_v55 }
 0x8db   :  { %v1950_v44 = vadd.f32 1.0, %v8461_v49  ;;  %v5695_v49 = vand.u32 4294901760, %v5694_v53 }
 0x8dc   :  { %v8463_v16 = vpop.eup %8462  ;;  %8474 = vrcp.f32 %v1951_v12  ;;  %v5702_v12 = vand.u32 4294901760, %v5701_v43 }
 0x8dd   :  { %v8465_v24 = vpop.eup %8464  ;;  %v1953_v51 = vadd.f32 1.0, %v8463_v16  ;;  %8476 = vrcp.f32 %v1950_v44 }
 0x8de   :  { %v8467_v9 = vpop.eup %8466  ;;  %v1952_v7 = vadd.f32 1.0, %v8465_v24  ;;  %v8159_v16 = vpack.c.bf16 %v5702_v12, %v5695_v49  ;;  %v9676_v24 = vpack.c.bf16 %v5699_v33, %v5692_v27 }
 0x8df   :  { %v8469_v30 = vpop.eup %8468  ;;  %8478 = vrcp.f32 %v1953_v51  ;;  %v1955_v19 = vadd.f32 1.0, %v8467_v9  ;;  %v9680_v9 = vpack.c.bf16 %v5700_v55, %v5693_v29 }
 0x8e0   :  { %v8471_v1 = vpop.eup %8470  ;;  %8480 = vrcp.f32 %v1952_v7  ;;  %v1954_v38 = vadd.f32 1.0, %v8469_v30 }
 0x8e1   :  { %v8473_v28 = vpop.eup %8472  ;;  %8482 = vrcp.f32 %v1955_v19  ;;  %v1957_v25 = vadd.f32 1.0, %v8471_v1 }
 0x8e2   :  { %8484 = vrcp.f32 %v1954_v38  ;;  %v1956_v41 = vadd.f32 1.0, %v8473_v28 }
 0x8e3   :  { %8486 = vrcp.f32 %v1957_v25 }
 0x8e4   :  { %8488 = vrcp.f32 %v1956_v41 }
 0x8e6   :  { %v8475_v14 = vpop.eup %8474 }
 0x8e7   :  { %v8477_v22 = vpop.eup %8476 }
 0x8e9   :  { %v8479_v61 = vpop.eup %8478 }
 0x8ea   :  { %v8481_v35 = vpop.eup %8480 }
 0x999   :  { %v7621_v40 = vpop.f32.mrb[22].mxu0 }
 0x99a   :  { %5446 = vrot.lane.b32.xlu1 %v7621_v40, %s8519_s24  ;;  %v5390_v6 = vpop.f32.mrb[23].mxu0  ;;  %v5685_v40 = vsub.f32 %v5477_v54, %v5531_v34 }
 0x99b   :  { %5444 = vrot.lane.b32.xlu0 %v5390_v6, %s8519_s24  ;;  %v8483_v6 = vpop.eup %8482 }
 0x99c   :  { %v9674_v44 = vpack.c.bf16 %v5685_v40, %v5678_v48 }
 0x99d   :  { %v7624_v39 = vpop.f32.mrb[24].mxu0 }
 0x99e   :  { %5450 = vrot.lane.b32.xlu1 %v7624_v39, %s8519_s24  ;;  %v5402_v10 = vpop.f32.mrb[25].mxu0 }
 0x99f   :  { %5448 = vrot.lane.b32.xlu0 %v5402_v10, %s8519_s24  ;;  %v8485_v10 = vpop.eup %8484 }
 0x9a0   :  { %v8487_v17 = vpop.eup %8486 }
 0x9a1   :  { %v7627_v5 = vpop.f32.mrb[26].mxu0  ;;  %v8489_v47 = vpop.eup %8488 }
 0x9a2   :  { %5454 = vrot.lane.b32.xlu1 %v7627_v5, %s8519_s24  ;;  %v5414_v2 = vpop.f32.mrb[27].mxu0 }
 0x9a3   :  { %5452 = vrot.lane.b32.xlu0 %v5414_v2, %s8519_s24 }
 0x9a5   :  { %v7630_v50 = vpop.f32.mrb[28].mxu0 }
 0x9a6   :  { %5458 = vrot.lane.b32.xlu1 %v7630_v50, %s8519_s24  ;;  %v5426_v59 = vpop.f32.mrb[29].mxu0  ;;  %v5679_v50 = vand.u32 4294901760, %v5678_v48 }
 0x9a7   :  { %5456 = vrot.lane.b32.xlu0 %v5426_v59, %s8519_s24  ;;  %v5686_v59 = vand.u32 4294901760, %v5685_v40 }
 0x9a8   :  { %v5680_v0 = vsub.f32 %v5678_v48, %v5679_v50 }
 0x9a9   :  { %v5687_v15 = vsub.f32 %v5685_v40, %v5686_v59  ;;  %v9678_v51 = vpack.c.bf16 %v5686_v59, %v5679_v50 }
 0x9aa   :  { %v5681_v63 = vand.u32 4294901760, %v5680_v0 }
 0x9ab   :  { %v5688_v13 = vand.u32 4294901760, %v5687_v15 }
 0x9ad   :  { %v8155_v46 = vpack.c.bf16 %v5688_v13, %v5681_v63 }
 0x9af   :  { %8156 = vmatprep.subr.bf16.mxu1 %v8155_v46 }
 0xa0c   :  { %v5447_v20 = vpop.permute.xlu1 %5446 }
 0xa0d   :  { %v5469_v37 = vmul.f32 %v8475_v14, %v5447_v20  ;;  %v5445_v62 = vpop.permute.xlu0 %5444 }
 0xa0e   :  { %v5468_v32 = vmul.f32 %v8477_v22, %v5445_v62 }
 0xa0f   :  { %5497 = vrot.lane.b32.xlu1 %v5469_v37, %s8520_s23 }
 0xa10   :  { %v5451_v18 = vpop.permute.xlu1 %5450  ;;  %5495 = vrot.lane.b32.xlu0 %v5468_v32, %s8520_s23 }
 0xa11   :  { %v5471_v36 = vmul.f32 %v8479_v61, %v5451_v18  ;;  %v5449_v8 = vpop.permute.xlu0 %5448 }
 0xa12   :  { %v5470_v45 = vmul.f32 %v8481_v35, %v5449_v8 }
 0xa13   :  { %5501 = vrot.lane.b32.xlu1 %v5471_v36, %s8520_s23 }
 0xa14   :  { %v5455_v39 = vpop.permute.xlu1 %5454  ;;  %5499 = vrot.lane.b32.xlu0 %v5470_v45, %s8520_s23 }
 0xa15   :  { %v5473_v5 = vmul.f32 %v8483_v6, %v5455_v39  ;;  %v5453_v2 = vpop.permute.xlu0 %5452 }
 0xa16   :  { %v5472_v4 = vmul.f32 %v8485_v10, %v5453_v2 }
 0xa17   :  { %5505 = vrot.lane.b32.xlu1 %v5473_v5, %s8520_s23 }
 0xa18   :  { %v5459_v42 = vpop.permute.xlu1 %5458  ;;  %5503 = vrot.lane.b32.xlu0 %v5472_v4, %s8520_s23 }
 0xa19   :  { %v5475_v23 = vmul.f32 %v8487_v17, %v5459_v42  ;;  %v5457_v52 = vpop.permute.xlu0 %5456 }
 0xa1a   :  { %v5474_v31 = vmul.f32 %v8489_v47, %v5457_v52 }
 0xa1b   :  { %5509 = vrot.lane.b32.xlu1 %v5475_v23, %s8520_s23 }
 0xa1c   :  { %5507 = vrot.lane.b32.xlu0 %v5474_v31, %s8520_s23 }
 0xa81   :  { %v5498_v7 = vpop.permute.xlu1 %5497 }
 0xa82   :  { %v5513_v30 = vsel %vm606_vm2, %v5498_v7, 0  ;;  %v5496_v19 = vpop.permute.xlu0 %5495 }
 0xa83   :  { %v9683_v1 = vand.u32 4294901760, %v5513_v30  ;;  %v5511_v38 = vsel %vm606_vm2, %v5496_v19, 0 }
 0xa84   :  { %v9686_v28 = vand.u32 4294901760, %v5511_v38 }
 0xa85   :  { %v9689_v11 = vsub.f32 %v5513_v30, %v9683_v1  ;;  %v5502_v54 = vpop.permute.xlu1 %5501 }
 0xa86   :  { %v9692_v3 = vsub.f32 %v5511_v38, %v9686_v28  ;;  %v5517_v34 = vsel %vm606_vm2, %v5502_v54, 0  ;;  %v5500_v25 = vpop.permute.xlu0 %5499 }
 0xa87   :  { %v5608_v41 = vand.u32 4294901760, %v9689_v11  ;;  %v9696_v14 = vand.u32 4294901760, %v5517_v34  ;;  %v5515_v20 = vsel %vm606_vm2, %v5500_v25, 0 }
 0xa88   :  { %v5598_v60 = vand.u32 4294901760, %v9692_v3  ;;  %v9700_v56 = vand.u32 4294901760, %v5515_v20 }
 0xa89   :  { %v5609_v22 = vsub.f32 %v9689_v11, %v5608_v41  ;;  %v9706_v37 = vsub.f32 %v5517_v34, %v9696_v14  ;;  %v5506_v62 = vpop.permute.xlu1 %5505 }
 0xa8a   :  { %v9709_v58 = vsub.f32 %v5515_v20, %v9700_v56  ;;  %v5521_v26 = vsel %vm606_vm2, %v5506_v62, 0  ;;  %v5504_v32 = vpop.permute.xlu0 %5503  ;;  %v5599_v61 = vsub.f32 %v9692_v3, %v5598_v60 }
 0xa8b   :  { %v5628_v18 = vand.u32 4294901760, %v9706_v37  ;;  %v9716_v35 = vand.u32 4294901760, %v5521_v26  ;;  %v5519_v36 = vsel %vm606_vm2, %v5504_v32, 0  ;;  %v5610_v40 = vand.u32 4294901760, %v5609_v22 }
 0xa8c   :  { %v5618_v8 = vand.u32 4294901760, %v9709_v58  ;;  %v9720_v45 = vand.u32 4294901760, %v5519_v36  ;;  %v5600_v48 = vand.u32 4294901760, %v5599_v61 }
 0xa8d   :  { %v9723_v6 = vsub.f32 %v5521_v26, %v9716_v35  ;;  %v5510_v39 = vpop.permute.xlu1 %5509  ;;  %v5629_v10 = vsub.f32 %v9706_v37, %v5628_v18 }
 0xa8e   :  { %v9729_v5 = vsub.f32 %v5519_v36, %v9720_v45  ;;  %v5525_v2 = vsel %vm606_vm2, %v5510_v39, 0  ;;  %7639 = vmatprep.mubr.f32.mxu1 %v5600_v48  ;;  %v5508_v50 = vpop.permute.xlu0 %5507  ;;  %v5619_v59 = vsub.f32 %v9709_v58, %v5618_v8 }
 0xa8f   :  { %v5648_v4 = vand.u32 4294901760, %v9723_v6  ;;  %v9736_v0 = vand.u32 4294901760, %v5525_v2  ;;  %v5523_v15 = vsel %vm606_vm2, %v5508_v50, 0  ;;  %7640 = vmatmul.mubr.f32.vlgmr.msra.gmra.mrb[14].mxu1 %v5610_v40  ;;  %v5630_v47 = vand.u32 4294901760, %v5629_v10 }
 0xa90   :  { %v5638_v27 = vand.u32 4294901760, %v9729_v5  ;;  %v9740_v33 = vand.u32 4294901760, %v5523_v15  ;;  %v5620_v17 = vand.u32 4294901760, %v5619_v59  ;;  %8158 = vmatpush3.bf16.msra.mxu1 %v8155_v46 }
 0xa91   :  { %v5667_v42 = vsub.f32 %v5525_v2, %v9736_v0  ;;  %v5649_v23 = vsub.f32 %v9723_v6, %v5648_v4  ;;  %8160 = vmatprep.subr.bf16.mxu1 %v8159_v16 }
 0xa92   :  { %v5657_v52 = vsub.f32 %v5523_v15, %v9740_v33  ;;  %7642 = vmatprep.mubr.f32.mxu1 %v5620_v17  ;;  %v5639_v63 = vsub.f32 %v9729_v5, %v5638_v27 }
 0xa93   :  { %v5668_v13 = vand.u32 4294901760, %v5667_v42  ;;  %7643 = vmatmul.mubr.f32.gmra.mrb[16].mxu1 %v5630_v47  ;;  %v5650_v55 = vand.u32 4294901760, %v5649_v23 }
 0xa94   :  { %v5658_v29 = vand.u32 4294901760, %v5657_v52  ;;  %v5640_v31 = vand.u32 4294901760, %v5639_v63  ;;  %8162 = vmatpush3.bf16.msra.mxu1 %v8159_v16 }
 0xa95   :  { %v5669_v53 = vsub.f32 %v5667_v42, %v5668_v13  ;;  %8164 = vmatprep.subr.bf16.mxu1 %v9674_v44 }
 0xa96   :  { %7645 = vmatprep.mubr.f32.mxu1 %v5640_v31  ;;  %v5659_v46 = vsub.f32 %v5657_v52, %v5658_v29 }
 0xa97   :  { %7646 = vmatmul.mubr.f32.gmra.mrb[18].mxu1 %v5650_v55  ;;  %v5670_v49 = vand.u32 4294901760, %v5669_v53 }
 0xa98   :  { %v5660_v43 = vand.u32 4294901760, %v5659_v46 }
 0xa9a   :  { %7648 = vmatprep.mubr.f32.mxu1 %v5660_v43 }
 0xa9b   :  { %7649 = vmatmul.mubr.f32.gmra.mrb[20].mxu1 %v5670_v49 }
 0xa9c   :  { %7659 = vmatprep.mubr.f32.mxu1 %v9686_v28 }
 0xa9f   :  { %7660 = vmatmul.mubr.f32.vlgmr.msra.gmra.mrb[14].mxu1 %v9683_v1 }
 0xaa0   :  { %7662 = vmatprep.mubr.f32.mxu1 %v9700_v56  ;;  %8166 = vmatpush3.bf16.msra.mxu1 %v9674_v44 }
 0xaa1   :  { %8168 = vmatprep.subr.bf16.mxu1 %v9676_v24 }
 0xaa3   :  { %7663 = vmatmul.mubr.f32.gmra.mrb[16].mxu1 %v9696_v14 }
 0xaa4   :  { %7665 = vmatprep.mubr.f32.mxu1 %v9720_v45  ;;  %8170 = vmatpush3.bf16.msra.mxu1 %v9676_v24 }
 0xaa5   :  { %8172 = vmatprep.subr.bf16.mxu1 %v9652_v21 }
 0xaa7   :  { %7666 = vmatmul.mubr.f32.gmra.mrb[18].mxu1 %v9716_v35 }
 0xaa8   :  { %7668 = vmatprep.mubr.f32.mxu1 %v9740_v33 }
 0xaab   :  { %7669 = vmatmul.mubr.f32.gmra.mrb[20].mxu1 %v9736_v0 }
 0xaac   :  { %7679 = vmatprep.mubr.f32.mxu1 %v9692_v3 }
 0xaaf   :  { %7680 = vmatmul.mubr.f32.vlgmr.msra.gmra.mrb[14].mxu1 %v9689_v11 }
 0xab0   :  { %7682 = vmatprep.mubr.f32.mxu1 %v9709_v58  ;;  %8174 = vmatpush3.bf16.msra.mxu1 %v9652_v21 }
 0xab1   :  { %8176 = vmatprep.subr.bf16.mxu1 %v9663_v57 }
 0xab3   :  { %7683 = vmatmul.mubr.f32.gmra.mrb[16].mxu1 %v9706_v37 }
 0xab4   :  { %7685 = vmatprep.mubr.f32.mxu1 %v9729_v5  ;;  %8178 = vmatpush3.bf16.msra.mxu1 %v9663_v57 }
 0xab5   :  { %8180 = vmatprep.subr.bf16.mxu1 %v9678_v51 }
 0xab7   :  { %7686 = vmatmul.mubr.f32.gmra.mrb[18].mxu1 %v9723_v6 }
 0xab8   :  { %7688 = vmatprep.mubr.f32.mxu1 %v5657_v52 }
 0xabb   :  { %7689 = vmatmul.mubr.f32.gmra.mrb[20].mxu1 %v5667_v42 }
 0xabc   :  { %7699 = vmatprep.mubr.f32.mxu1 %v5598_v60 }
 0xabf   :  { %7700 = vmatmul.mubr.f32.vlgmr.msra.gmra.mrb[14].mxu1 %v5608_v41 }
 0xac0   :  { %7702 = vmatprep.mubr.f32.mxu1 %v5618_v8  ;;  %8182 = vmatpush3.bf16.msra.mxu1 %v9678_v51 }
 0xac1   :  { %8184 = vmatprep.subr.bf16.mxu1 %v9680_v9 }
 0xac3   :  { %7703 = vmatmul.mubr.f32.gmra.mrb[16].mxu1 %v5628_v18 }
 0xac4   :  { %7705 = vmatprep.mubr.f32.mxu1 %v5638_v27  ;;  %8186 = vmatpush3.bf16.msra.mxu1 %v9680_v9 }
 0xac5   :  { %8188 = vmatprep.subr.bf16.mxu1 %v9652_v21 }
 0xac7   :  { %7706 = vmatmul.mubr.f32.gmra.mrb[18].mxu1 %v5648_v4 }
 0xac8   :  { %7708 = vmatprep.mubr.f32.mxu1 %v5658_v29 }
 0xacb   :  { %7709 = vmatmul.mubr.f32.gmra.mrb[20].mxu1 %v5668_v13 }
 0xacc   :  { %7719 = vmatprep.mubr.f32.mxu1 %v9686_v28 }
 0xacf   :  { %7720 = vmatmul.mubr.f32.vlgmr.msra.gmra.mrb[14].mxu1 %v9683_v1 }
 0xad0   :  { %7722 = vmatprep.mubr.f32.mxu1 %v9700_v56  ;;  %8190 = vmatpush3.bf16.msra.mxu1 %v9652_v21  ;;  %v6346_v21 = vld [vmem:[%s9835_s12] ss:$0 sm:$0xff]  ;;  %s8521_s12 = smov [#allocation2]  }
 0xad1   :  { %8192 = vmatprep.subr.bf16.mxu1 %v9663_v57  ;;  %s6326_s10 = sshll.u32 %s8521_s12, 4  ;;  %s6327_s10 = int_to_ptr.vmem [resolvable:$true] %s6326_s10 }
 0xad2   :  { %s8490_s25 = scalar_lea.vmem %s6327_s10, 1024  ;;  %p8495_p1 = scmp.lt.s32.totalorder %s6327_s10, %s6327_s10 }
 0xad3   :  { %7723 = vmatmul.mubr.f32.gmra.mrb[16].mxu1 %v9696_v14  ;;  %p8491_p0 = scmp.ne.s32.totalorder %s6327_s10, %s8490_s25  ;;  %p8496_p2 = scmp.lt.s32.totalorder %s8490_s25, %s8490_s25 }
 0xad4   :  { %7725 = vmatprep.mubr.f32.mxu1 %v9720_v45  ;;  %8194 = vmatpush3.bf16.msra.mxu1 %v9663_v57 }
 0xad5   :  { %p8497_p3 = por %p8496_p2, %p8495_p1 }
 0xad7   :  { %7726 = vmatmul.mubr.f32.gmra.mrb[18].mxu1 %v9716_v35  ;;  %p8498_p4 = pnand %p8497_p3, %p8491_p0 }
 0xad8   :  { %7728 = vmatprep.mubr.f32.mxu1 %v9740_v33 }
 0xadb   :  { %7729 = vmatmul.mubr.f32.gmra.mrb[20].mxu1 %v9736_v0 }
 0xadc   :  { %7739 = vmatprep.mubr.f32.mxu1 %v9686_v28 }
 0xadf   :  { %7740 = vmatmul.mubr.f32.vlgmr.msra.gmra.mrb[14].mxu1 %v9683_v1 }
 0xae0   :  { %7742 = vmatprep.mubr.f32.mxu1 %v9700_v56 }
 0xae3   :  { %7743 = vmatmul.mubr.f32.gmra.mrb[16].mxu1 %v9696_v14 }
 0xae4   :  { %7745 = vmatprep.mubr.f32.mxu1 %v9720_v45 }
 0xae7   :  { %7746 = vmatmul.mubr.f32.gmra.mrb[18].mxu1 %v9716_v35 }
 0xae8   :  { %7748 = vmatprep.mubr.f32.mxu1 %v9740_v33 }
 0xaeb   :  { %7749 = vmatmul.mubr.f32.gmra.mrb[20].mxu1 %v9736_v0 }
 0xbb2   :  { %v7741_v57 = vpop.f32.mrb[14].mxu1 }
 0xbb3   :  { %v8211_v12 = vadd.f32 %v7741_v57, %v6346_v21  ;;  %v6267_v16 = vpop.f32.mrb[15].mxu1 }
 0xbb4   :  { %v8212_v44 = vadd.f32 %v6346_v21, %v6267_v16 }
 0xbb5   :  { %6314 = vst.msk [vmem:[#allocation2 + $0x8] sm:$0xff] %vm606_vm2, %v8211_v12 }
 0xbb6   :  { %6313 = vst.msk [vmem:[#allocation2] sm:$0xff] %vm606_vm2, %v8212_v44  ;;  %v7744_v24 = vpop.f32.mrb[16].mxu1 }
 0xbb7   :  { %v8213_v51 = vadd.f32 %v7744_v24, %v6346_v21  ;;  %v6279_v9 = vpop.f32.mrb[17].mxu1 }
 0xbb8   :  { %v8214_v7 = vadd.f32 %v6346_v21, %v6279_v9 }
 0xbb9   :  { %6316 = vst.msk [vmem:[#allocation2 + $0x18] sm:$0xff] %vm606_vm2, %v8213_v51 }
 0xbba   :  { %6315 = vst.msk [vmem:[#allocation2 + $0x10] sm:$0xff] %vm606_vm2, %v8214_v7  ;;  %v7747_v30 = vpop.f32.mrb[18].mxu1 }
 0xbbb   :  { %v8215_v19 = vadd.f32 %v7747_v30, %v6346_v21  ;;  %v6291_v1 = vpop.f32.mrb[19].mxu1 }
 0xbbc   :  { %v8216_v38 = vadd.f32 %v6346_v21, %v6291_v1 }
 0xbbd   :  { %6318 = vst.msk [vmem:[#allocation2 + $0x28] sm:$0xff] %vm606_vm2, %v8215_v19 }
 0xbbe   :  { %6317 = vst.msk [vmem:[#allocation2 + $0x20] sm:$0xff] %vm606_vm2, %v8216_v38  ;;  %v7750_v28 = vpop.f32.mrb[20].mxu1 }
 0xbbf   :  { %v8217_v11 = vadd.f32 %v7750_v28, %v6346_v21  ;;  %v6303_v54 = vpop.f32.mrb[21].mxu1 }
 0xbc0   :  { %v8218_v3 = vadd.f32 %v6346_v21, %v6303_v54 }
 0xbc1   :  { %6320 = vst.msk [vmem:[#allocation2 + $0x38] sm:$0xff] %vm606_vm2, %v8217_v11 }
 0xbc2   :  { %6319 = vst.msk [vmem:[#allocation2 + $0x30] sm:$0xff] %vm606_vm2, %v8218_v3 }
 0xbc3   :  { %8501 = shalt.err (!%p8498_p4)
}
 0xbc4   :  { %s8502_s1 = scalar_lea.hbm %s9836_s13, 1024 }
 0xbc5   :  { %p8503_p5 = scmp.ne.s32.totalorder %s9836_s13, %s8502_s1  ;;  %p8506_p6 = scmp.lt.u32.totalorder %s8502_s1, %s9836_s13 }
 0xbc7   :  { %p8508_p7 = pnand %p8506_p6, %p8503_p5 }
 0xbc9   :  { %8511 = shalt.err (!%p8508_p7)
}
 0xbca   :  { %s8522_s28 = smov 128   ;;  %s8523_s29 = smov 8  }
 0xbcb   :  { %6332 = dma.vmem_to_hbm [thread:$0]  %s6327_s10, 1024, %s9836_s13, [#allocation3], %s8522_s28, %s8522_s28, %s8523_s29  }
 0xbcc   :  { %8512 = dma.done.wait [#allocation3], 1024  }
 0xbcd   :  { %8513 = vsyncadd [#allocation3], 4294966272 }
 0xbce   :  { %6336 = vsyncpa [#allocation3], 1 }

</bundles_post_ra>
